<compile_context>
chip_gen: v5e
topology: v5e:2x2
jax: 0.10.0
libtpu: 0.0.40
codegen_flags: <defaults>
</compile_context>

<pallas_src>
import functools

import jax
import jax.numpy as jnp
from jax.experimental import pallas as pl
from jax.experimental.pallas import tpu as pltpu

# Fixed geometry from the PyTorch module: Conv2d(1, 20, 5) -> Conv2d(20, 20, 5).
KH = KW = 5
C_IN = 1
C_MID = 20        # conv1 output channels
C_OUT = 20        # conv2 output channels
K1P = 32          # conv1 im2col contraction (KH*KW = 25 padded to 32)
C1P = 32          # conv1 channels padded (per-tap contraction K of conv2)
C2P = 128         # conv2 output channels padded to one full lane width


def _fused_conv_relu_kernel(p_ref, w1_ref, b1_ref, w2_ref, b2_ref, o_ref, h_ref,
                            *, oh1, ow1p, oh2, ow2):
    """relu(conv2(relu(conv1(x)))) for one image, intermediate kept in VMEM.

    p_ref : (oh1*ow1p, K1P)    conv1 im2col patches (row index = y*ow1p + x)
    w1_ref: (K1P, C1P)         conv1 weights as a (taps x out-channels) matrix
    b1_ref: (1, C1P)           conv1 bias (zero padded)
    w2_ref: (KH*KW, C1P, C2P)  conv2 weights per tap, bf16 (zero padded)
    b2_ref: (1, C2P)           conv2 bias (zero padded)
    o_ref : (oh2*ow2, C2P)     flattened output positions x padded channels
    h_ref : (oh1, ow1p, C1P)   VMEM scratch holding the conv1 activation
    """
    # ---- Stage 1: conv1 + bias + ReLU as ONE MXU matmul over the padded
    #      25-tap contraction; result written to scratch in aligned 16-row
    #      chunks (ow1p is a multiple of 8, so each store is tile-friendly).
    h = jnp.dot(p_ref[...], w1_ref[...], preferred_element_type=jnp.float32)
    h = jnp.maximum(h + b1_ref[...], 0.0)                      # (oh1*ow1p, C1P)
    for a in range(oh1):
        h_ref[a, :, :] = h[a * ow1p:(a + 1) * ow1p, :]

    # ---- Stage 2: conv2 + bias + ReLU as 25 MXU matmuls (bf16 inputs,
    #      f32 accumulation), bias folded into the accumulator init.
    #      Padded channels carry exact zeros, so they contribute nothing.
    acc = jnp.broadcast_to(b2_ref[...], (oh2 * ow2, C2P))       # (64, 128) f32
    for ki in range(KH):
        for kj in range(KW):
            lhs = h_ref[ki:ki + oh2, kj:kj + ow2, :].reshape(oh2 * ow2, C1P)
            acc = acc + jnp.dot(lhs.astype(jnp.bfloat16),
                                w2_ref[ki * KW + kj],
                                preferred_element_type=jnp.float32)
    o_ref[...] = jnp.maximum(acc, 0.0)                          # lane-dense store


@jax.jit
def _fused_forward(x_nchw, w1m, b1p, w2t, b2p):
    n, cin, height, width = x_nchw.shape
    assert cin == C_IN
    oh1, ow1 = height - KH + 1, width - KW + 1
    oh2, ow2 = oh1 - KH + 1, ow1 - KW + 1
    ow1p = (ow1 + 7) // 8 * 8        # sublane-align the activation row stride

    # im2col for conv1 (Cin == 1): (N, oh1*ow1p, K1P) with taps on lanes; the
    # padded rows/columns are zero and never influence the valid outputs.
    x2 = x_nchw[:, 0]                                            # (N, H, W)
    taps = [x2[:, ki:ki + oh1, kj:kj + ow1]
            for ki in range(KH) for kj in range(KW)]
    patches = jnp.stack(taps, axis=-1)                           # (N, oh1, ow1, 25)
    patches = jnp.pad(patches, ((0, 0), (0, 0),
                                (0, ow1p - ow1), (0, K1P - KH * KW)))
    patches = patches.reshape(n, oh1 * ow1p, K1P)

    kernel = functools.partial(_fused_conv_relu_kernel,
                               oh1=oh1, ow1p=ow1p, oh2=oh2, ow2=ow2)

    out = pl.pallas_call(
        kernel,
        out_shape=jax.ShapeDtypeStruct((n, oh2 * ow2, C2P), jnp.float32),
        grid=(n,),
        in_specs=[
            pl.BlockSpec((None, oh1 * ow1p, K1P), lambda i: (i, 0, 0)),
            pl.BlockSpec((K1P, C1P), lambda i: (0, 0)),
            pl.BlockSpec((1, C1P), lambda i: (0, 0)),
            pl.BlockSpec((KH * KW, C1P, C2P), lambda i: (0, 0, 0)),
            pl.BlockSpec((1, C2P), lambda i: (0, 0)),
        ],
        out_specs=pl.BlockSpec((None, oh2 * ow2, C2P), lambda i: (i, 0, 0)),
        scratch_shapes=[pltpu.VMEM((oh1, ow1p, C1P), jnp.float32)],
        compiler_params=pltpu.CompilerParams(
            dimension_semantics=("parallel",)),   # v7x: one image per TensorCore
    )(patches, w1m, b1p, w2t, b2p)

    # Small epilogue fusion: drop channel padding, back to NCHW (spec layout).
    out = out.reshape(n, oh2, ow2, C2P)[..., :C_OUT]
    return jnp.transpose(out, (0, 3, 1, 2))


class PallasModel:
    """Deterministically-initialized stand-in for the PyTorch Model."""

    def __init__(self, key):
        k1, k2, k3, k4 = jax.random.split(key, 4)
        # PyTorch-layout (OIHW) parameters.
        self.w1 = jax.random.normal(k1, (C_MID, C_IN, KH, KW), jnp.float32) * 0.1
        self.b1 = jax.random.normal(k2, (C_MID,), jnp.float32) * 0.1
        self.w2 = jax.random.normal(k3, (C_OUT, C_MID, KH, KW), jnp.float32) * 0.05
        self.b2 = jax.random.normal(k4, (C_OUT,), jnp.float32) * 0.1

        # One-time repack into the kernel's padded, lane-friendly layouts.
        # conv1: (taps, out-ch) matrix, both dims padded to 32. Stays f32.
        w1m = jnp.transpose(self.w1[:, 0], (1, 2, 0)).reshape(KH * KW, C_MID)
        self.w1m = jnp.pad(w1m, ((0, K1P - KH * KW), (0, C1P - C_MID)))
        self.b1p = jnp.pad(self.b1, (0, C1P - C_MID)).reshape(1, C1P)
        # conv2: per-tap (Cin, Cout) matrices; Cin padded only to 32, Cout to
        # 128; bf16 weights (accumulation stays f32 inside the kernel).
        w2t = jnp.transpose(self.w2, (2, 3, 1, 0)).reshape(KH * KW, C_MID, C_OUT)
        w2t = jnp.pad(w2t, ((0, 0), (0, C1P - C_MID), (0, C2P - C_OUT)))
        self.w2t = w2t.astype(jnp.bfloat16)
        self.b2p = jnp.pad(self.b2, (0, C2P - C_OUT)).reshape(1, C2P)

    def __call__(self, x):
        return _fused_forward(x, self.w1m, self.b1p, self.w2t, self.b2p)


def _reference_forward(x, w1, b1, w2, b2):
    def conv(x, w, b):
        y = jax.lax.conv_general_dilated(
            x, w, window_strides=(1, 1), padding="VALID",
            dimension_numbers=("NCHW", "OIHW", "NCHW"),
            precision=jax.lax.Precision.HIGHEST)
        return jax.nn.relu(y + b[None, :, None, None])
    return conv(conv(x, w1, b1), w2, b2)


if __name__ == "__main__":
    key = jax.random.PRNGKey(0)
    kx, kp = jax.random.split(key)

    # batch=2, in_channels=1 (as nn.Conv2d(1, 20, 5) requires), spatial=16x16
    x = jax.random.normal(kx, (2, 1, 16, 16), jnp.float32)

    model = PallasModel(kp)
    out = jax.block_until_ready(model(x))
    assert out.shape == (2, C_OUT, 8, 8), out.shape

    ref = jax.block_until_ready(
        _reference_forward(x, model.w1, model.b1, model.w2, model.b2))
    assert jnp.allclose(out, ref, atol=2e-2, rtol=2e-2), float(
        jnp.max(jnp.abs(out - ref)))

    print("KERNEL_OK")
</pallas_src>

<mosaic_0001>
module attributes {stable_mosaic.version = 11 : i64} {
  func.func @_fused_conv_relu_kernel(%arg0: i32, %arg1: memref<1x192x32xf32, #tpu.memory_space<vmem>>, %arg2: memref<32x32xf32, #tpu.memory_space<vmem>>, %arg3: memref<1x32xf32, #tpu.memory_space<vmem>>, %arg4: memref<25x32x128xbf16, #tpu.memory_space<vmem>>, %arg5: memref<1x128xf32, #tpu.memory_space<vmem>>, %arg6: memref<1x64x128xf32, #tpu.memory_space<vmem>>, %arg7: memref<12x16x32xf32, #tpu.memory_space<vmem>>) attributes {dimension_semantics = [#tpu.dimension_semantics<parallel>], iteration_bounds = array<i64: 2>, scalar_prefetch = 0 : i64, scratch_operands = 1 : i64, tpu.core_type = #tpu.core_type<tc>, window_params = [{transform_indices = @transform_0, window_bounds = array<i64: 1, 192, 32>}, {pipeline_mode = #tpu.pipeline_mode<synchronous>, transform_indices = @transform_1, window_bounds = array<i64: 32, 32>}, {pipeline_mode = #tpu.pipeline_mode<synchronous>, transform_indices = @transform_2, window_bounds = array<i64: 1, 32>}, {pipeline_mode = #tpu.pipeline_mode<synchronous>, transform_indices = @transform_3, window_bounds = array<i64: 25, 32, 128>}, {pipeline_mode = #tpu.pipeline_mode<synchronous>, transform_indices = @transform_4, window_bounds = array<i64: 1, 128>}, {transform_indices = @transform_5, window_bounds = array<i64: 1, 64, 128>}]} {
    %c0 = arith.constant 0 : index
    %c0_0 = arith.constant 0 : index
    %c0_1 = arith.constant 0 : index
    %0 = vector.load %arg1[%c0, %c0_0, %c0_1] : memref<1x192x32xf32, #tpu.memory_space<vmem>>, vector<1x192x32xf32>
    %1 = vector.shape_cast %0 : vector<1x192x32xf32> to vector<192x32xf32>
    %c0_2 = arith.constant 0 : index
    %c0_3 = arith.constant 0 : index
    %2 = vector.load %arg2[%c0_2, %c0_3] : memref<32x32xf32, #tpu.memory_space<vmem>>, vector<32x32xf32>
    %cst = arith.constant dense<0.000000e+00> : vector<192x32xf32>
    %3 = tpu.matmul %1, %2, %cst {dimension_numbers = #tpu.dot_dimension_numbers<[1], [0], [0], [1], [0, 0, 1, 1], [], []>} : vector<192x32xf32>, vector<32x32xf32>, vector<192x32xf32> -> vector<192x32xf32>
    %c0_4 = arith.constant 0 : index
    %c0_5 = arith.constant 0 : index
    %4 = vector.load %arg3[%c0_4, %c0_5] : memref<1x32xf32, #tpu.memory_space<vmem>>, vector<1x32xf32>
    %5 = vector.broadcast %4 : vector<1x32xf32> to vector<192x32xf32>
    %6 = arith.addf %3, %5 : vector<192x32xf32>
    %cst_6 = arith.constant 0.000000e+00 : f32
    %7 = vector.broadcast %cst_6 : f32 to vector<192x32xf32>
    %8 = arith.maximumf %6, %7 : vector<192x32xf32>
    %9 = vector.extract_strided_slice %8 {offsets = [0, 0], sizes = [16, 32], strides = [1, 1]} : vector<192x32xf32> to vector<16x32xf32>
    %c0_7 = arith.constant 0 : index
    %c0_8 = arith.constant 0 : index
    %c0_9 = arith.constant 0 : index
    %10 = vector.load %arg7[%c0_7, %c0_8, %c0_9] : memref<12x16x32xf32, #tpu.memory_space<vmem>>, vector<1x16x32xf32>
    %11 = vector.shape_cast %10 : vector<1x16x32xf32> to vector<16x32xf32>
    %12 = vector.shape_cast %9 : vector<16x32xf32> to vector<1x16x32xf32>
    tpu.vector_store %arg7[%c0_7, %c0_8, %c0_9], %12 {strides = array<i32>} : memref<12x16x32xf32, #tpu.memory_space<vmem>>, vector<1x16x32xf32>,
    %13 = vector.extract_strided_slice %8 {offsets = [16, 0], sizes = [16, 32], strides = [1, 1]} : vector<192x32xf32> to vector<16x32xf32>
    %c1 = arith.constant 1 : index
    %c0_10 = arith.constant 0 : index
    %c0_11 = arith.constant 0 : index
    %14 = vector.load %arg7[%c1, %c0_10, %c0_11] : memref<12x16x32xf32, #tpu.memory_space<vmem>>, vector<1x16x32xf32>
    %15 = vector.shape_cast %14 : vector<1x16x32xf32> to vector<16x32xf32>
    %16 = vector.shape_cast %13 : vector<16x32xf32> to vector<1x16x32xf32>
    tpu.vector_store %arg7[%c1, %c0_10, %c0_11], %16 {strides = array<i32>} : memref<12x16x32xf32, #tpu.memory_space<vmem>>, vector<1x16x32xf32>,
    %17 = vector.extract_strided_slice %8 {offsets = [32, 0], sizes = [16, 32], strides = [1, 1]} : vector<192x32xf32> to vector<16x32xf32>
    %c2 = arith.constant 2 : index
    %c0_12 = arith.constant 0 : index
    %c0_13 = arith.constant 0 : index
    %18 = vector.load %arg7[%c2, %c0_12, %c0_13] : memref<12x16x32xf32, #tpu.memory_space<vmem>>, vector<1x16x32xf32>
    %19 = vector.shape_cast %18 : vector<1x16x32xf32> to vector<16x32xf32>
    %20 = vector.shape_cast %17 : vector<16x32xf32> to vector<1x16x32xf32>
    tpu.vector_store %arg7[%c2, %c0_12, %c0_13], %20 {strides = array<i32>} : memref<12x16x32xf32, #tpu.memory_space<vmem>>, vector<1x16x32xf32>,
    %21 = vector.extract_strided_slice %8 {offsets = [48, 0], sizes = [16, 32], strides = [1, 1]} : vector<192x32xf32> to vector<16x32xf32>
    %c3 = arith.constant 3 : index
    %c0_14 = arith.constant 0 : index
    %c0_15 = arith.constant 0 : index
    %22 = vector.load %arg7[%c3, %c0_14, %c0_15] : memref<12x16x32xf32, #tpu.memory_space<vmem>>, vector<1x16x32xf32>
    %23 = vector.shape_cast %22 : vector<1x16x32xf32> to vector<16x32xf32>
    %24 = vector.shape_cast %21 : vector<16x32xf32> to vector<1x16x32xf32>
    tpu.vector_store %arg7[%c3, %c0_14, %c0_15], %24 {strides = array<i32>} : memref<12x16x32xf32, #tpu.memory_space<vmem>>, vector<1x16x32xf32>,
    %25 = vector.extract_strided_slice %8 {offsets = [64, 0], sizes = [16, 32], strides = [1, 1]} : vector<192x32xf32> to vector<16x32xf32>
    %c4 = arith.constant 4 : index
    %c0_16 = arith.constant 0 : index
    %c0_17 = arith.constant 0 : index
    %26 = vector.load %arg7[%c4, %c0_16, %c0_17] : memref<12x16x32xf32, #tpu.memory_space<vmem>>, vector<1x16x32xf32>
    %27 = vector.shape_cast %26 : vector<1x16x32xf32> to vector<16x32xf32>
    %28 = vector.shape_cast %25 : vector<16x32xf32> to vector<1x16x32xf32>
    tpu.vector_store %arg7[%c4, %c0_16, %c0_17], %28 {strides = array<i32>} : memref<12x16x32xf32, #tpu.memory_space<vmem>>, vector<1x16x32xf32>,
    %29 = vector.extract_strided_slice %8 {offsets = [80, 0], sizes = [16, 32], strides = [1, 1]} : vector<192x32xf32> to vector<16x32xf32>
    %c5 = arith.constant 5 : index
    %c0_18 = arith.constant 0 : index
    %c0_19 = arith.constant 0 : index
    %30 = vector.load %arg7[%c5, %c0_18, %c0_19] : memref<12x16x32xf32, #tpu.memory_space<vmem>>, vector<1x16x32xf32>
    %31 = vector.shape_cast %30 : vector<1x16x32xf32> to vector<16x32xf32>
    %32 = vector.shape_cast %29 : vector<16x32xf32> to vector<1x16x32xf32>
    tpu.vector_store %arg7[%c5, %c0_18, %c0_19], %32 {strides = array<i32>} : memref<12x16x32xf32, #tpu.memory_space<vmem>>, vector<1x16x32xf32>,
    %33 = vector.extract_strided_slice %8 {offsets = [96, 0], sizes = [16, 32], strides = [1, 1]} : vector<192x32xf32> to vector<16x32xf32>
    %c6 = arith.constant 6 : index
    %c0_20 = arith.constant 0 : index
    %c0_21 = arith.constant 0 : index
    %34 = vector.load %arg7[%c6, %c0_20, %c0_21] : memref<12x16x32xf32, #tpu.memory_space<vmem>>, vector<1x16x32xf32>
    %35 = vector.shape_cast %34 : vector<1x16x32xf32> to vector<16x32xf32>
    %36 = vector.shape_cast %33 : vector<16x32xf32> to vector<1x16x32xf32>
    tpu.vector_store %arg7[%c6, %c0_20, %c0_21], %36 {strides = array<i32>} : memref<12x16x32xf32, #tpu.memory_space<vmem>>, vector<1x16x32xf32>,
    %37 = vector.extract_strided_slice %8 {offsets = [112, 0], sizes = [16, 32], strides = [1, 1]} : vector<192x32xf32> to vector<16x32xf32>
    %c7 = arith.constant 7 : index
    %c0_22 = arith.constant 0 : index
    %c0_23 = arith.constant 0 : index
    %38 = vector.load %arg7[%c7, %c0_22, %c0_23] : memref<12x16x32xf32, #tpu.memory_space<vmem>>, vector<1x16x32xf32>
    %39 = vector.shape_cast %38 : vector<1x16x32xf32> to vector<16x32xf32>
    %40 = vector.shape_cast %37 : vector<16x32xf32> to vector<1x16x32xf32>
    tpu.vector_store %arg7[%c7, %c0_22, %c0_23], %40 {strides = array<i32>} : memref<12x16x32xf32, #tpu.memory_space<vmem>>, vector<1x16x32xf32>,
    %41 = vector.extract_strided_slice %8 {offsets = [128, 0], sizes = [16, 32], strides = [1, 1]} : vector<192x32xf32> to vector<16x32xf32>
    %c8 = arith.constant 8 : index
    %c0_24 = arith.constant 0 : index
    %c0_25 = arith.constant 0 : index
    %42 = vector.load %arg7[%c8, %c0_24, %c0_25] : memref<12x16x32xf32, #tpu.memory_space<vmem>>, vector<1x16x32xf32>
    %43 = vector.shape_cast %42 : vector<1x16x32xf32> to vector<16x32xf32>
    %44 = vector.shape_cast %41 : vector<16x32xf32> to vector<1x16x32xf32>
    tpu.vector_store %arg7[%c8, %c0_24, %c0_25], %44 {strides = array<i32>} : memref<12x16x32xf32, #tpu.memory_space<vmem>>, vector<1x16x32xf32>,
    %45 = vector.extract_strided_slice %8 {offsets = [144, 0], sizes = [16, 32], strides = [1, 1]} : vector<192x32xf32> to vector<16x32xf32>
    %c9 = arith.constant 9 : index
    %c0_26 = arith.constant 0 : index
    %c0_27 = arith.constant 0 : index
    %46 = vector.load %arg7[%c9, %c0_26, %c0_27] : memref<12x16x32xf32, #tpu.memory_space<vmem>>, vector<1x16x32xf32>
    %47 = vector.shape_cast %46 : vector<1x16x32xf32> to vector<16x32xf32>
    %48 = vector.shape_cast %45 : vector<16x32xf32> to vector<1x16x32xf32>
    tpu.vector_store %arg7[%c9, %c0_26, %c0_27], %48 {strides = array<i32>} : memref<12x16x32xf32, #tpu.memory_space<vmem>>, vector<1x16x32xf32>,
    %49 = vector.extract_strided_slice %8 {offsets = [160, 0], sizes = [16, 32], strides = [1, 1]} : vector<192x32xf32> to vector<16x32xf32>
    %c10 = arith.constant 10 : index
    %c0_28 = arith.constant 0 : index
    %c0_29 = arith.constant 0 : index
    %50 = vector.load %arg7[%c10, %c0_28, %c0_29] : memref<12x16x32xf32, #tpu.memory_space<vmem>>, vector<1x16x32xf32>
    %51 = vector.shape_cast %50 : vector<1x16x32xf32> to vector<16x32xf32>
    %52 = vector.shape_cast %49 : vector<16x32xf32> to vector<1x16x32xf32>
    tpu.vector_store %arg7[%c10, %c0_28, %c0_29], %52 {strides = array<i32>} : memref<12x16x32xf32, #tpu.memory_space<vmem>>, vector<1x16x32xf32>,
    %53 = vector.extract_strided_slice %8 {offsets = [176, 0], sizes = [16, 32], strides = [1, 1]} : vector<192x32xf32> to vector<16x32xf32>
    %c11 = arith.constant 11 : index
    %c0_30 = arith.constant 0 : index
    %c0_31 = arith.constant 0 : index
    %54 = vector.load %arg7[%c11, %c0_30, %c0_31] : memref<12x16x32xf32, #tpu.memory_space<vmem>>, vector<1x16x32xf32>
    %55 = vector.shape_cast %54 : vector<1x16x32xf32> to vector<16x32xf32>
    %56 = vector.shape_cast %53 : vector<16x32xf32> to vector<1x16x32xf32>
    tpu.vector_store %arg7[%c11, %c0_30, %c0_31], %56 {strides = array<i32>} : memref<12x16x32xf32, #tpu.memory_space<vmem>>, vector<1x16x32xf32>,
    %c0_32 = arith.constant 0 : index
    %c0_33 = arith.constant 0 : index
    %57 = vector.load %arg5[%c0_32, %c0_33] : memref<1x128xf32, #tpu.memory_space<vmem>>, vector<1x128xf32>
    %58 = vector.shape_cast %57 : vector<1x128xf32> to vector<1x128xf32>
    %59 = vector.broadcast %58 : vector<1x128xf32> to vector<64x128xf32>
    %c0_34 = arith.constant 0 : index
    %c0_35 = arith.constant 0 : index
    %c0_36 = arith.constant 0 : index
    %60 = vector.load %arg7[%c0_34, %c0_35, %c0_36] : memref<12x16x32xf32, #tpu.memory_space<vmem>>, vector<8x8x32xf32>
    %61 = vector.shape_cast %60 : vector<8x8x32xf32> to vector<64x32xf32>
    %62 = arith.truncf %61 : vector<64x32xf32> to vector<64x32xbf16>
    %c0_37 = arith.constant 0 : index
    %c0_38 = arith.constant 0 : index
    %c0_39 = arith.constant 0 : index
    %63 = vector.load %arg4[%c0_37, %c0_38, %c0_39] : memref<25x32x128xbf16, #tpu.memory_space<vmem>>, vector<1x32x128xbf16>
    %64 = vector.shape_cast %63 : vector<1x32x128xbf16> to vector<32x128xbf16>
    %cst_40 = arith.constant dense<0.000000e+00> : vector<64x128xf32>
    %65 = tpu.matmul %62, %64, %cst_40 {dimension_numbers = #tpu.dot_dimension_numbers<[1], [0], [0], [1], [0, 0, 1, 1], [], []>} : vector<64x32xbf16>, vector<32x128xbf16>, vector<64x128xf32> -> vector<64x128xf32>
    %66 = arith.addf %59, %65 : vector<64x128xf32>
    %c0_41 = arith.constant 0 : index
    %c1_42 = arith.constant 1 : index
    %c0_43 = arith.constant 0 : index
    %67 = vector.load %arg7[%c0_41, %c1_42, %c0_43] : memref<12x16x32xf32, #tpu.memory_space<vmem>>, vector<8x8x32xf32>
    %68 = vector.shape_cast %67 : vector<8x8x32xf32> to vector<64x32xf32>
    %69 = arith.truncf %68 : vector<64x32xf32> to vector<64x32xbf16>
    %c1_44 = arith.constant 1 : index
    %c0_45 = arith.constant 0 : index
    %c0_46 = arith.constant 0 : index
    %70 = vector.load %arg4[%c1_44, %c0_45, %c0_46] : memref<25x32x128xbf16, #tpu.memory_space<vmem>>, vector<1x32x128xbf16>
    %71 = vector.shape_cast %70 : vector<1x32x128xbf16> to vector<32x128xbf16>
    %cst_47 = arith.constant dense<0.000000e+00> : vector<64x128xf32>
    %72 = tpu.matmul %69, %71, %cst_47 {dimension_numbers = #tpu.dot_dimension_numbers<[1], [0], [0], [1], [0, 0, 1, 1], [], []>} : vector<64x32xbf16>, vector<32x128xbf16>, vector<64x128xf32> -> vector<64x128xf32>
    %73 = arith.addf %66, %72 : vector<64x128xf32>
    %c0_48 = arith.constant 0 : index
    %c2_49 = arith.constant 2 : index
    %c0_50 = arith.constant 0 : index
    %74 = vector.load %arg7[%c0_48, %c2_49, %c0_50] : memref<12x16x32xf32, #tpu.memory_space<vmem>>, vector<8x8x32xf32>
    %75 = vector.shape_cast %74 : vector<8x8x32xf32> to vector<64x32xf32>
    %76 = arith.truncf %75 : vector<64x32xf32> to vector<64x32xbf16>
    %c2_51 = arith.constant 2 : index
    %c0_52 = arith.constant 0 : index
    %c0_53 = arith.constant 0 : index
    %77 = vector.load %arg4[%c2_51, %c0_52, %c0_53] : memref<25x32x128xbf16, #tpu.memory_space<vmem>>, vector<1x32x128xbf16>
    %78 = vector.shape_cast %77 : vector<1x32x128xbf16> to vector<32x128xbf16>
    %cst_54 = arith.constant dense<0.000000e+00> : vector<64x128xf32>
    %79 = tpu.matmul %76, %78, %cst_54 {dimension_numbers = #tpu.dot_dimension_numbers<[1], [0], [0], [1], [0, 0, 1, 1], [], []>} : vector<64x32xbf16>, vector<32x128xbf16>, vector<64x128xf32> -> vector<64x128xf32>
    %80 = arith.addf %73, %79 : vector<64x128xf32>
    %c0_55 = arith.constant 0 : index
    %c3_56 = arith.constant 3 : index
    %c0_57 = arith.constant 0 : index
    %81 = vector.load %arg7[%c0_55, %c3_56, %c0_57] : memref<12x16x32xf32, #tpu.memory_space<vmem>>, vector<8x8x32xf32>
    %82 = vector.shape_cast %81 : vector<8x8x32xf32> to vector<64x32xf32>
    %83 = arith.truncf %82 : vector<64x32xf32> to vector<64x32xbf16>
    %c3_58 = arith.constant 3 : index
    %c0_59 = arith.constant 0 : index
    %c0_60 = arith.constant 0 : index
    %84 = vector.load %arg4[%c3_58, %c0_59, %c0_60] : memref<25x32x128xbf16, #tpu.memory_space<vmem>>, vector<1x32x128xbf16>
    %85 = vector.shape_cast %84 : vector<1x32x128xbf16> to vector<32x128xbf16>
    %cst_61 = arith.constant dense<0.000000e+00> : vector<64x128xf32>
    %86 = tpu.matmul %83, %85, %cst_61 {dimension_numbers = #tpu.dot_dimension_numbers<[1], [0], [0], [1], [0, 0, 1, 1], [], []>} : vector<64x32xbf16>, vector<32x128xbf16>, vector<64x128xf32> -> vector<64x128xf32>
    %87 = arith.addf %80, %86 : vector<64x128xf32>
    %c0_62 = arith.constant 0 : index
    %c4_63 = arith.constant 4 : index
    %c0_64 = arith.constant 0 : index
    %88 = vector.load %arg7[%c0_62, %c4_63, %c0_64] : memref<12x16x32xf32, #tpu.memory_space<vmem>>, vector<8x8x32xf32>
    %89 = vector.shape_cast %88 : vector<8x8x32xf32> to vector<64x32xf32>
    %90 = arith.truncf %89 : vector<64x32xf32> to vector<64x32xbf16>
    %c4_65 = arith.constant 4 : index
    %c0_66 = arith.constant 0 : index
    %c0_67 = arith.constant 0 : index
    %91 = vector.load %arg4[%c4_65, %c0_66, %c0_67] : memref<25x32x128xbf16, #tpu.memory_space<vmem>>, vector<1x32x128xbf16>
    %92 = vector.shape_cast %91 : vector<1x32x128xbf16> to vector<32x128xbf16>
    %cst_68 = arith.constant dense<0.000000e+00> : vector<64x128xf32>
    %93 = tpu.matmul %90, %92, %cst_68 {dimension_numbers = #tpu.dot_dimension_numbers<[1], [0], [0], [1], [0, 0, 1, 1], [], []>} : vector<64x32xbf16>, vector<32x128xbf16>, vector<64x128xf32> -> vector<64x128xf32>
    %94 = arith.addf %87, %93 : vector<64x128xf32>
    %c1_69 = arith.constant 1 : index
    %c0_70 = arith.constant 0 : index
    %c0_71 = arith.constant 0 : index
    %95 = vector.load %arg7[%c1_69, %c0_70, %c0_71] : memref<12x16x32xf32, #tpu.memory_space<vmem>>, vector<8x8x32xf32>
    %96 = vector.shape_cast %95 : vector<8x8x32xf32> to vector<64x32xf32>
    %97 = arith.truncf %96 : vector<64x32xf32> to vector<64x32xbf16>
    %c5_72 = arith.constant 5 : index
    %c0_73 = arith.constant 0 : index
    %c0_74 = arith.constant 0 : index
    %98 = vector.load %arg4[%c5_72, %c0_73, %c0_74] : memref<25x32x128xbf16, #tpu.memory_space<vmem>>, vector<1x32x128xbf16>
    %99 = vector.shape_cast %98 : vector<1x32x128xbf16> to vector<32x128xbf16>
    %cst_75 = arith.constant dense<0.000000e+00> : vector<64x128xf32>
    %100 = tpu.matmul %97, %99, %cst_75 {dimension_numbers = #tpu.dot_dimension_numbers<[1], [0], [0], [1], [0, 0, 1, 1], [], []>} : vector<64x32xbf16>, vector<32x128xbf16>, vector<64x128xf32> -> vector<64x128xf32>
    %101 = arith.addf %94, %100 : vector<64x128xf32>
    %c1_76 = arith.constant 1 : index
    %c1_77 = arith.constant 1 : index
    %c0_78 = arith.constant 0 : index
    %102 = vector.load %arg7[%c1_76, %c1_77, %c0_78] : memref<12x16x32xf32, #tpu.memory_space<vmem>>, vector<8x8x32xf32>
    %103 = vector.shape_cast %102 : vector<8x8x32xf32> to vector<64x32xf32>
    %104 = arith.truncf %103 : vector<64x32xf32> to vector<64x32xbf16>
    %c6_79 = arith.constant 6 : index
    %c0_80 = arith.constant 0 : index
    %c0_81 = arith.constant 0 : index
    %105 = vector.load %arg4[%c6_79, %c0_80, %c0_81] : memref<25x32x128xbf16, #tpu.memory_space<vmem>>, vector<1x32x128xbf16>
    %106 = vector.shape_cast %105 : vector<1x32x128xbf16> to vector<32x128xbf16>
    %cst_82 = arith.constant dense<0.000000e+00> : vector<64x128xf32>
    %107 = tpu.matmul %104, %106, %cst_82 {dimension_numbers = #tpu.dot_dimension_numbers<[1], [0], [0], [1], [0, 0, 1, 1], [], []>} : vector<64x32xbf16>, vector<32x128xbf16>, vector<64x128xf32> -> vector<64x128xf32>
    %108 = arith.addf %101, %107 : vector<64x128xf32>
    %c1_83 = arith.constant 1 : index
    %c2_84 = arith.constant 2 : index
    %c0_85 = arith.constant 0 : index
    %109 = vector.load %arg7[%c1_83, %c2_84, %c0_85] : memref<12x16x32xf32, #tpu.memory_space<vmem>>, vector<8x8x32xf32>
    %110 = vector.shape_cast %109 : vector<8x8x32xf32> to vector<64x32xf32>
    %111 = arith.truncf %110 : vector<64x32xf32> to vector<64x32xbf16>
    %c7_86 = arith.constant 7 : index
    %c0_87 = arith.constant 0 : index
    %c0_88 = arith.constant 0 : index
    %112 = vector.load %arg4[%c7_86, %c0_87, %c0_88] : memref<25x32x128xbf16, #tpu.memory_space<vmem>>, vector<1x32x128xbf16>
    %113 = vector.shape_cast %112 : vector<1x32x128xbf16> to vector<32x128xbf16>
    %cst_89 = arith.constant dense<0.000000e+00> : vector<64x128xf32>
    %114 = tpu.matmul %111, %113, %cst_89 {dimension_numbers = #tpu.dot_dimension_numbers<[1], [0], [0], [1], [0, 0, 1, 1], [], []>} : vector<64x32xbf16>, vector<32x128xbf16>, vector<64x128xf32> -> vector<64x128xf32>
    %115 = arith.addf %108, %114 : vector<64x128xf32>
    %c1_90 = arith.constant 1 : index
    %c3_91 = arith.constant 3 : index
    %c0_92 = arith.constant 0 : index
    %116 = vector.load %arg7[%c1_90, %c3_91, %c0_92] : memref<12x16x32xf32, #tpu.memory_space<vmem>>, vector<8x8x32xf32>
    %117 = vector.shape_cast %116 : vector<8x8x32xf32> to vector<64x32xf32>
    %118 = arith.truncf %117 : vector<64x32xf32> to vector<64x32xbf16>
    %c8_93 = arith.constant 8 : index
    %c0_94 = arith.constant 0 : index
    %c0_95 = arith.constant 0 : index
    %119 = vector.load %arg4[%c8_93, %c0_94, %c0_95] : memref<25x32x128xbf16, #tpu.memory_space<vmem>>, vector<1x32x128xbf16>
    %120 = vector.shape_cast %119 : vector<1x32x128xbf16> to vector<32x128xbf16>
    %cst_96 = arith.constant dense<0.000000e+00> : vector<64x128xf32>
    %121 = tpu.matmul %118, %120, %cst_96 {dimension_numbers = #tpu.dot_dimension_numbers<[1], [0], [0], [1], [0, 0, 1, 1], [], []>} : vector<64x32xbf16>, vector<32x128xbf16>, vector<64x128xf32> -> vector<64x128xf32>
    %122 = arith.addf %115, %121 : vector<64x128xf32>
    %c1_97 = arith.constant 1 : index
    %c4_98 = arith.constant 4 : index
    %c0_99 = arith.constant 0 : index
    %123 = vector.load %arg7[%c1_97, %c4_98, %c0_99] : memref<12x16x32xf32, #tpu.memory_space<vmem>>, vector<8x8x32xf32>
    %124 = vector.shape_cast %123 : vector<8x8x32xf32> to vector<64x32xf32>
    %125 = arith.truncf %124 : vector<64x32xf32> to vector<64x32xbf16>
    %c9_100 = arith.constant 9 : index
    %c0_101 = arith.constant 0 : index
    %c0_102 = arith.constant 0 : index
    %126 = vector.load %arg4[%c9_100, %c0_101, %c0_102] : memref<25x32x128xbf16, #tpu.memory_space<vmem>>, vector<1x32x128xbf16>
    %127 = vector.shape_cast %126 : vector<1x32x128xbf16> to vector<32x128xbf16>
    %cst_103 = arith.constant dense<0.000000e+00> : vector<64x128xf32>
    %128 = tpu.matmul %125, %127, %cst_103 {dimension_numbers = #tpu.dot_dimension_numbers<[1], [0], [0], [1], [0, 0, 1, 1], [], []>} : vector<64x32xbf16>, vector<32x128xbf16>, vector<64x128xf32> -> vector<64x128xf32>
    %129 = arith.addf %122, %128 : vector<64x128xf32>
    %c2_104 = arith.constant 2 : index
    %c0_105 = arith.constant 0 : index
    %c0_106 = arith.constant 0 : index
    %130 = vector.load %arg7[%c2_104, %c0_105, %c0_106] : memref<12x16x32xf32, #tpu.memory_space<vmem>>, vector<8x8x32xf32>
    %131 = vector.shape_cast %130 : vector<8x8x32xf32> to vector<64x32xf32>
    %132 = arith.truncf %131 : vector<64x32xf32> to vector<64x32xbf16>
    %c10_107 = arith.constant 10 : index
    %c0_108 = arith.constant 0 : index
    %c0_109 = arith.constant 0 : index
    %133 = vector.load %arg4[%c10_107, %c0_108, %c0_109] : memref<25x32x128xbf16, #tpu.memory_space<vmem>>, vector<1x32x128xbf16>
    %134 = vector.shape_cast %133 : vector<1x32x128xbf16> to vector<32x128xbf16>
    %cst_110 = arith.constant dense<0.000000e+00> : vector<64x128xf32>
    %135 = tpu.matmul %132, %134, %cst_110 {dimension_numbers = #tpu.dot_dimension_numbers<[1], [0], [0], [1], [0, 0, 1, 1], [], []>} : vector<64x32xbf16>, vector<32x128xbf16>, vector<64x128xf32> -> vector<64x128xf32>
    %136 = arith.addf %129, %135 : vector<64x128xf32>
    %c2_111 = arith.constant 2 : index
    %c1_112 = arith.constant 1 : index
    %c0_113 = arith.constant 0 : index
    %137 = vector.load %arg7[%c2_111, %c1_112, %c0_113] : memref<12x16x32xf32, #tpu.memory_space<vmem>>, vector<8x8x32xf32>
    %138 = vector.shape_cast %137 : vector<8x8x32xf32> to vector<64x32xf32>
    %139 = arith.truncf %138 : vector<64x32xf32> to vector<64x32xbf16>
    %c11_114 = arith.constant 11 : index
    %c0_115 = arith.constant 0 : index
    %c0_116 = arith.constant 0 : index
    %140 = vector.load %arg4[%c11_114, %c0_115, %c0_116] : memref<25x32x128xbf16, #tpu.memory_space<vmem>>, vector<1x32x128xbf16>
    %141 = vector.shape_cast %140 : vector<1x32x128xbf16> to vector<32x128xbf16>
    %cst_117 = arith.constant dense<0.000000e+00> : vector<64x128xf32>
    %142 = tpu.matmul %139, %141, %cst_117 {dimension_numbers = #tpu.dot_dimension_numbers<[1], [0], [0], [1], [0, 0, 1, 1], [], []>} : vector<64x32xbf16>, vector<32x128xbf16>, vector<64x128xf32> -> vector<64x128xf32>
    %143 = arith.addf %136, %142 : vector<64x128xf32>
    %c2_118 = arith.constant 2 : index
    %c2_119 = arith.constant 2 : index
    %c0_120 = arith.constant 0 : index
    %144 = vector.load %arg7[%c2_118, %c2_119, %c0_120] : memref<12x16x32xf32, #tpu.memory_space<vmem>>, vector<8x8x32xf32>
    %145 = vector.shape_cast %144 : vector<8x8x32xf32> to vector<64x32xf32>
    %146 = arith.truncf %145 : vector<64x32xf32> to vector<64x32xbf16>
    %c12 = arith.constant 12 : index
    %c0_121 = arith.constant 0 : index
    %c0_122 = arith.constant 0 : index
    %147 = vector.load %arg4[%c12, %c0_121, %c0_122] : memref<25x32x128xbf16, #tpu.memory_space<vmem>>, vector<1x32x128xbf16>
    %148 = vector.shape_cast %147 : vector<1x32x128xbf16> to vector<32x128xbf16>
    %cst_123 = arith.constant dense<0.000000e+00> : vector<64x128xf32>
    %149 = tpu.matmul %146, %148, %cst_123 {dimension_numbers = #tpu.dot_dimension_numbers<[1], [0], [0], [1], [0, 0, 1, 1], [], []>} : vector<64x32xbf16>, vector<32x128xbf16>, vector<64x128xf32> -> vector<64x128xf32>
    %150 = arith.addf %143, %149 : vector<64x128xf32>
    %c2_124 = arith.constant 2 : index
    %c3_125 = arith.constant 3 : index
    %c0_126 = arith.constant 0 : index
    %151 = vector.load %arg7[%c2_124, %c3_125, %c0_126] : memref<12x16x32xf32, #tpu.memory_space<vmem>>, vector<8x8x32xf32>
    %152 = vector.shape_cast %151 : vector<8x8x32xf32> to vector<64x32xf32>
    %153 = arith.truncf %152 : vector<64x32xf32> to vector<64x32xbf16>
    %c13 = arith.constant 13 : index
    %c0_127 = arith.constant 0 : index
    %c0_128 = arith.constant 0 : index
    %154 = vector.load %arg4[%c13, %c0_127, %c0_128] : memref<25x32x128xbf16, #tpu.memory_space<vmem>>, vector<1x32x128xbf16>
    %155 = vector.shape_cast %154 : vector<1x32x128xbf16> to vector<32x128xbf16>
    %cst_129 = arith.constant dense<0.000000e+00> : vector<64x128xf32>
    %156 = tpu.matmul %153, %155, %cst_129 {dimension_numbers = #tpu.dot_dimension_numbers<[1], [0], [0], [1], [0, 0, 1, 1], [], []>} : vector<64x32xbf16>, vector<32x128xbf16>, vector<64x128xf32> -> vector<64x128xf32>
    %157 = arith.addf %150, %156 : vector<64x128xf32>
    %c2_130 = arith.constant 2 : index
    %c4_131 = arith.constant 4 : index
    %c0_132 = arith.constant 0 : index
    %158 = vector.load %arg7[%c2_130, %c4_131, %c0_132] : memref<12x16x32xf32, #tpu.memory_space<vmem>>, vector<8x8x32xf32>
    %159 = vector.shape_cast %158 : vector<8x8x32xf32> to vector<64x32xf32>
    %160 = arith.truncf %159 : vector<64x32xf32> to vector<64x32xbf16>
    %c14 = arith.constant 14 : index
    %c0_133 = arith.constant 0 : index
    %c0_134 = arith.constant 0 : index
    %161 = vector.load %arg4[%c14, %c0_133, %c0_134] : memref<25x32x128xbf16, #tpu.memory_space<vmem>>, vector<1x32x128xbf16>
    %162 = vector.shape_cast %161 : vector<1x32x128xbf16> to vector<32x128xbf16>
    %cst_135 = arith.constant dense<0.000000e+00> : vector<64x128xf32>
    %163 = tpu.matmul %160, %162, %cst_135 {dimension_numbers = #tpu.dot_dimension_numbers<[1], [0], [0], [1], [0, 0, 1, 1], [], []>} : vector<64x32xbf16>, vector<32x128xbf16>, vector<64x128xf32> -> vector<64x128xf32>
    %164 = arith.addf %157, %163 : vector<64x128xf32>
    %c3_136 = arith.constant 3 : index
    %c0_137 = arith.constant 0 : index
    %c0_138 = arith.constant 0 : index
    %165 = vector.load %arg7[%c3_136, %c0_137, %c0_138] : memref<12x16x32xf32, #tpu.memory_space<vmem>>, vector<8x8x32xf32>
    %166 = vector.shape_cast %165 : vector<8x8x32xf32> to vector<64x32xf32>
    %167 = arith.truncf %166 : vector<64x32xf32> to vector<64x32xbf16>
    %c15 = arith.constant 15 : index
    %c0_139 = arith.constant 0 : index
    %c0_140 = arith.constant 0 : index
    %168 = vector.load %arg4[%c15, %c0_139, %c0_140] : memref<25x32x128xbf16, #tpu.memory_space<vmem>>, vector<1x32x128xbf16>
    %169 = vector.shape_cast %168 : vector<1x32x128xbf16> to vector<32x128xbf16>
    %cst_141 = arith.constant dense<0.000000e+00> : vector<64x128xf32>
    %170 = tpu.matmul %167, %169, %cst_141 {dimension_numbers = #tpu.dot_dimension_numbers<[1], [0], [0], [1], [0, 0, 1, 1], [], []>} : vector<64x32xbf16>, vector<32x128xbf16>, vector<64x128xf32> -> vector<64x128xf32>
    %171 = arith.addf %164, %170 : vector<64x128xf32>
    %c3_142 = arith.constant 3 : index
    %c1_143 = arith.constant 1 : index
    %c0_144 = arith.constant 0 : index
    %172 = vector.load %arg7[%c3_142, %c1_143, %c0_144] : memref<12x16x32xf32, #tpu.memory_space<vmem>>, vector<8x8x32xf32>
    %173 = vector.shape_cast %172 : vector<8x8x32xf32> to vector<64x32xf32>
    %174 = arith.truncf %173 : vector<64x32xf32> to vector<64x32xbf16>
    %c16 = arith.constant 16 : index
    %c0_145 = arith.constant 0 : index
    %c0_146 = arith.constant 0 : index
    %175 = vector.load %arg4[%c16, %c0_145, %c0_146] : memref<25x32x128xbf16, #tpu.memory_space<vmem>>, vector<1x32x128xbf16>
    %176 = vector.shape_cast %175 : vector<1x32x128xbf16> to vector<32x128xbf16>
    %cst_147 = arith.constant dense<0.000000e+00> : vector<64x128xf32>
    %177 = tpu.matmul %174, %176, %cst_147 {dimension_numbers = #tpu.dot_dimension_numbers<[1], [0], [0], [1], [0, 0, 1, 1], [], []>} : vector<64x32xbf16>, vector<32x128xbf16>, vector<64x128xf32> -> vector<64x128xf32>
    %178 = arith.addf %171, %177 : vector<64x128xf32>
    %c3_148 = arith.constant 3 : index
    %c2_149 = arith.constant 2 : index
    %c0_150 = arith.constant 0 : index
    %179 = vector.load %arg7[%c3_148, %c2_149, %c0_150] : memref<12x16x32xf32, #tpu.memory_space<vmem>>, vector<8x8x32xf32>
    %180 = vector.shape_cast %179 : vector<8x8x32xf32> to vector<64x32xf32>
    %181 = arith.truncf %180 : vector<64x32xf32> to vector<64x32xbf16>
    %c17 = arith.constant 17 : index
    %c0_151 = arith.constant 0 : index
    %c0_152 = arith.constant 0 : index
    %182 = vector.load %arg4[%c17, %c0_151, %c0_152] : memref<25x32x128xbf16, #tpu.memory_space<vmem>>, vector<1x32x128xbf16>
    %183 = vector.shape_cast %182 : vector<1x32x128xbf16> to vector<32x128xbf16>
    %cst_153 = arith.constant dense<0.000000e+00> : vector<64x128xf32>
    %184 = tpu.matmul %181, %183, %cst_153 {dimension_numbers = #tpu.dot_dimension_numbers<[1], [0], [0], [1], [0, 0, 1, 1], [], []>} : vector<64x32xbf16>, vector<32x128xbf16>, vector<64x128xf32> -> vector<64x128xf32>
    %185 = arith.addf %178, %184 : vector<64x128xf32>
    %c3_154 = arith.constant 3 : index
    %c3_155 = arith.constant 3 : index
    %c0_156 = arith.constant 0 : index
    %186 = vector.load %arg7[%c3_154, %c3_155, %c0_156] : memref<12x16x32xf32, #tpu.memory_space<vmem>>, vector<8x8x32xf32>
    %187 = vector.shape_cast %186 : vector<8x8x32xf32> to vector<64x32xf32>
    %188 = arith.truncf %187 : vector<64x32xf32> to vector<64x32xbf16>
    %c18 = arith.constant 18 : index
    %c0_157 = arith.constant 0 : index
    %c0_158 = arith.constant 0 : index
    %189 = vector.load %arg4[%c18, %c0_157, %c0_158] : memref<25x32x128xbf16, #tpu.memory_space<vmem>>, vector<1x32x128xbf16>
    %190 = vector.shape_cast %189 : vector<1x32x128xbf16> to vector<32x128xbf16>
    %cst_159 = arith.constant dense<0.000000e+00> : vector<64x128xf32>
    %191 = tpu.matmul %188, %190, %cst_159 {dimension_numbers = #tpu.dot_dimension_numbers<[1], [0], [0], [1], [0, 0, 1, 1], [], []>} : vector<64x32xbf16>, vector<32x128xbf16>, vector<64x128xf32> -> vector<64x128xf32>
    %192 = arith.addf %185, %191 : vector<64x128xf32>
    %c3_160 = arith.constant 3 : index
    %c4_161 = arith.constant 4 : index
    %c0_162 = arith.constant 0 : index
    %193 = vector.load %arg7[%c3_160, %c4_161, %c0_162] : memref<12x16x32xf32, #tpu.memory_space<vmem>>, vector<8x8x32xf32>
    %194 = vector.shape_cast %193 : vector<8x8x32xf32> to vector<64x32xf32>
    %195 = arith.truncf %194 : vector<64x32xf32> to vector<64x32xbf16>
    %c19 = arith.constant 19 : index
    %c0_163 = arith.constant 0 : index
    %c0_164 = arith.constant 0 : index
    %196 = vector.load %arg4[%c19, %c0_163, %c0_164] : memref<25x32x128xbf16, #tpu.memory_space<vmem>>, vector<1x32x128xbf16>
    %197 = vector.shape_cast %196 : vector<1x32x128xbf16> to vector<32x128xbf16>
    %cst_165 = arith.constant dense<0.000000e+00> : vector<64x128xf32>
    %198 = tpu.matmul %195, %197, %cst_165 {dimension_numbers = #tpu.dot_dimension_numbers<[1], [0], [0], [1], [0, 0, 1, 1], [], []>} : vector<64x32xbf16>, vector<32x128xbf16>, vector<64x128xf32> -> vector<64x128xf32>
    %199 = arith.addf %192, %198 : vector<64x128xf32>
    %c4_166 = arith.constant 4 : index
    %c0_167 = arith.constant 0 : index
    %c0_168 = arith.constant 0 : index
    %200 = vector.load %arg7[%c4_166, %c0_167, %c0_168] : memref<12x16x32xf32, #tpu.memory_space<vmem>>, vector<8x8x32xf32>
    %201 = vector.shape_cast %200 : vector<8x8x32xf32> to vector<64x32xf32>
    %202 = arith.truncf %201 : vector<64x32xf32> to vector<64x32xbf16>
    %c20 = arith.constant 20 : index
    %c0_169 = arith.constant 0 : index
    %c0_170 = arith.constant 0 : index
    %203 = vector.load %arg4[%c20, %c0_169, %c0_170] : memref<25x32x128xbf16, #tpu.memory_space<vmem>>, vector<1x32x128xbf16>
    %204 = vector.shape_cast %203 : vector<1x32x128xbf16> to vector<32x128xbf16>
    %cst_171 = arith.constant dense<0.000000e+00> : vector<64x128xf32>
    %205 = tpu.matmul %202, %204, %cst_171 {dimension_numbers = #tpu.dot_dimension_numbers<[1], [0], [0], [1], [0, 0, 1, 1], [], []>} : vector<64x32xbf16>, vector<32x128xbf16>, vector<64x128xf32> -> vector<64x128xf32>
    %206 = arith.addf %199, %205 : vector<64x128xf32>
    %c4_172 = arith.constant 4 : index
    %c1_173 = arith.constant 1 : index
    %c0_174 = arith.constant 0 : index
    %207 = vector.load %arg7[%c4_172, %c1_173, %c0_174] : memref<12x16x32xf32, #tpu.memory_space<vmem>>, vector<8x8x32xf32>
    %208 = vector.shape_cast %207 : vector<8x8x32xf32> to vector<64x32xf32>
    %209 = arith.truncf %208 : vector<64x32xf32> to vector<64x32xbf16>
    %c21 = arith.constant 21 : index
    %c0_175 = arith.constant 0 : index
    %c0_176 = arith.constant 0 : index
    %210 = vector.load %arg4[%c21, %c0_175, %c0_176] : memref<25x32x128xbf16, #tpu.memory_space<vmem>>, vector<1x32x128xbf16>
    %211 = vector.shape_cast %210 : vector<1x32x128xbf16> to vector<32x128xbf16>
    %cst_177 = arith.constant dense<0.000000e+00> : vector<64x128xf32>
    %212 = tpu.matmul %209, %211, %cst_177 {dimension_numbers = #tpu.dot_dimension_numbers<[1], [0], [0], [1], [0, 0, 1, 1], [], []>} : vector<64x32xbf16>, vector<32x128xbf16>, vector<64x128xf32> -> vector<64x128xf32>
    %213 = arith.addf %206, %212 : vector<64x128xf32>
    %c4_178 = arith.constant 4 : index
    %c2_179 = arith.constant 2 : index
    %c0_180 = arith.constant 0 : index
    %214 = vector.load %arg7[%c4_178, %c2_179, %c0_180] : memref<12x16x32xf32, #tpu.memory_space<vmem>>, vector<8x8x32xf32>
    %215 = vector.shape_cast %214 : vector<8x8x32xf32> to vector<64x32xf32>
    %216 = arith.truncf %215 : vector<64x32xf32> to vector<64x32xbf16>
    %c22 = arith.constant 22 : index
    %c0_181 = arith.constant 0 : index
    %c0_182 = arith.constant 0 : index
    %217 = vector.load %arg4[%c22, %c0_181, %c0_182] : memref<25x32x128xbf16, #tpu.memory_space<vmem>>, vector<1x32x128xbf16>
    %218 = vector.shape_cast %217 : vector<1x32x128xbf16> to vector<32x128xbf16>
    %cst_183 = arith.constant dense<0.000000e+00> : vector<64x128xf32>
    %219 = tpu.matmul %216, %218, %cst_183 {dimension_numbers = #tpu.dot_dimension_numbers<[1], [0], [0], [1], [0, 0, 1, 1], [], []>} : vector<64x32xbf16>, vector<32x128xbf16>, vector<64x128xf32> -> vector<64x128xf32>
    %220 = arith.addf %213, %219 : vector<64x128xf32>
    %c4_184 = arith.constant 4 : index
    %c3_185 = arith.constant 3 : index
    %c0_186 = arith.constant 0 : index
    %221 = vector.load %arg7[%c4_184, %c3_185, %c0_186] : memref<12x16x32xf32, #tpu.memory_space<vmem>>, vector<8x8x32xf32>
    %222 = vector.shape_cast %221 : vector<8x8x32xf32> to vector<64x32xf32>
    %223 = arith.truncf %222 : vector<64x32xf32> to vector<64x32xbf16>
    %c23 = arith.constant 23 : index
    %c0_187 = arith.constant 0 : index
    %c0_188 = arith.constant 0 : index
    %224 = vector.load %arg4[%c23, %c0_187, %c0_188] : memref<25x32x128xbf16, #tpu.memory_space<vmem>>, vector<1x32x128xbf16>
    %225 = vector.shape_cast %224 : vector<1x32x128xbf16> to vector<32x128xbf16>
    %cst_189 = arith.constant dense<0.000000e+00> : vector<64x128xf32>
    %226 = tpu.matmul %223, %225, %cst_189 {dimension_numbers = #tpu.dot_dimension_numbers<[1], [0], [0], [1], [0, 0, 1, 1], [], []>} : vector<64x32xbf16>, vector<32x128xbf16>, vector<64x128xf32> -> vector<64x128xf32>
    %227 = arith.addf %220, %226 : vector<64x128xf32>
    %c4_190 = arith.constant 4 : index
    %c4_191 = arith.constant 4 : index
    %c0_192 = arith.constant 0 : index
    %228 = vector.load %arg7[%c4_190, %c4_191, %c0_192] : memref<12x16x32xf32, #tpu.memory_space<vmem>>, vector<8x8x32xf32>
    %229 = vector.shape_cast %228 : vector<8x8x32xf32> to vector<64x32xf32>
    %230 = arith.truncf %229 : vector<64x32xf32> to vector<64x32xbf16>
    %c24 = arith.constant 24 : index
    %c0_193 = arith.constant 0 : index
    %c0_194 = arith.constant 0 : index
    %231 = vector.load %arg4[%c24, %c0_193, %c0_194] : memref<25x32x128xbf16, #tpu.memory_space<vmem>>, vector<1x32x128xbf16>
    %232 = vector.shape_cast %231 : vector<1x32x128xbf16> to vector<32x128xbf16>
    %cst_195 = arith.constant dense<0.000000e+00> : vector<64x128xf32>
    %233 = tpu.matmul %230, %232, %cst_195 {dimension_numbers = #tpu.dot_dimension_numbers<[1], [0], [0], [1], [0, 0, 1, 1], [], []>} : vector<64x32xbf16>, vector<32x128xbf16>, vector<64x128xf32> -> vector<64x128xf32>
    %234 = arith.addf %227, %233 : vector<64x128xf32>
    %cst_196 = arith.constant 0.000000e+00 : f32
    %235 = vector.broadcast %cst_196 : f32 to vector<64x128xf32>
    %236 = arith.maximumf %234, %235 : vector<64x128xf32>
    %c0_197 = arith.constant 0 : index
    %c0_198 = arith.constant 0 : index
    %c0_199 = arith.constant 0 : index
    %237 = vector.load %arg6[%c0_197, %c0_198, %c0_199] : memref<1x64x128xf32, #tpu.memory_space<vmem>>, vector<1x64x128xf32>
    %238 = vector.shape_cast %237 : vector<1x64x128xf32> to vector<64x128xf32>
    %239 = vector.shape_cast %236 : vector<64x128xf32> to vector<1x64x128xf32>
    tpu.vector_store %arg6[%c0_197, %c0_198, %c0_199], %239 {strides = array<i32>} : memref<1x64x128xf32, #tpu.memory_space<vmem>>, vector<1x64x128xf32>,
    return
  }
  func.func @transform_0(%arg0: i32) -> (i32, i32, i32) {
    %c0_i32 = arith.constant 0 : i32
    %c0_i32_0 = arith.constant 0 : i32
    %c0_i32_1 = arith.constant 0 : i32
    return %arg0, %c0_i32, %c0_i32_0 : i32, i32, i32
  }
  func.func @transform_1(%arg0: i32) -> (i32, i32) {
    %c0_i32 = arith.constant 0 : i32
    %c0_i32_0 = arith.constant 0 : i32
    %c0_i32_1 = arith.constant 0 : i32
    return %c0_i32, %c0_i32_0 : i32, i32
  }
  func.func @transform_2(%arg0: i32) -> (i32, i32) {
    %c0_i32 = arith.constant 0 : i32
    %c0_i32_0 = arith.constant 0 : i32
    %c0_i32_1 = arith.constant 0 : i32
    return %c0_i32, %c0_i32_0 : i32, i32
  }
  func.func @transform_3(%arg0: i32) -> (i32, i32, i32) {
    %c0_i32 = arith.constant 0 : i32
    %c0_i32_0 = arith.constant 0 : i32
    %c0_i32_1 = arith.constant 0 : i32
    %c0_i32_2 = arith.constant 0 : i32
    return %c0_i32, %c0_i32_0, %c0_i32_1 : i32, i32, i32
  }
  func.func @transform_4(%arg0: i32) -> (i32, i32) {
    %c0_i32 = arith.constant 0 : i32
    %c0_i32_0 = arith.constant 0 : i32
    %c0_i32_1 = arith.constant 0 : i32
    return %c0_i32, %c0_i32_0 : i32, i32
  }
  func.func @transform_5(%arg0: i32) -> (i32, i32, i32) {
    %c0_i32 = arith.constant 0 : i32
    %c0_i32_0 = arith.constant 0 : i32
    %c0_i32_1 = arith.constant 0 : i32
    return %arg0, %c0_i32, %c0_i32_0 : i32, i32, i32
  }
}

</mosaic_0001>

<bundles_post_ra>
// kernel: _fused_forward.1
= control target key start
LH: loop header
LB: loop body
LE: loop exit
PB: predicated region body
PF: predicated region fallthrough
CT: control target
= control target key end

     0   :  { %s3033_s18 = smov 0   ;;  %s3960_s0 = inlined_call_operand.vmem [shape: f32[2,192,32], index: 0, kind: input, shape index: {}]   ;;  %s3961_s1 = inlined_call_operand.vmem [shape: f32[32,32], index: 1, kind: input, shape index: {}]   ;;  %s3962_s2 = inlined_call_operand.vmem [shape: f32[1,32], index: 2, kind: input, shape index: {}]   ;;  %s3963_s3 = inlined_call_operand.vmem [shape: bf16[25,32,128], index: 3, kind: input, shape index: {}]   ;;  %s3964_s4 = inlined_call_operand.vmem [shape: f32[1,128], index: 4, kind: input, shape index: {}]   ;;  %s3965_s5 = inlined_call_operand.vmem [shape: f32[2,64,128], index: 5, kind: output, shape index: {}]  }
   0x1 LB: > { %s2503_s19 = sadd.s32 4294967295, %s3001_s18   ;;  %p2507_p0 = scmp.ge.s32.totalorder %s3001_s18, 1  ;;  %s3001_s18 = sphi %s3033_s18, %s15_s18  }
   0x2   : > { %p187_p1 = scmp.lt.s32.totalorder %s3001_s18, 3 }
   0x4   : > { %p188_p2 = pnand %p2507_p0, %p187_p1 }
   0x5   : > { %p215_p3 = scmp.lt.s32.totalorder (!%p188_p2), %s2503_s19, 1 }
   0x6   : > { %191 = sbr.rel (%p188_p2) target bundleno = 810 (0x32a), region = 40 }
   0xb   : > { %v253_v0 = vld [vmem:[%s3961_s1 + $0x18] sm:$0xff]  ;;  %v252_v1 = vld [vmem:[%s3961_s1 + $0x10] sm:$0xff]  ;;  %v251_v2 = vld [vmem:[%s3961_s1 + $0x8] sm:$0xff]  ;;  %s3967_s19 = smov (!%p215_p3, %s2503_s19), 1  ;;  %vm258_vm0 = vcmask 261120  }
   0xc   : > { %343 = vmatpush.msra.mxu0 %v253_v0  ;;  %v250_v3 = vld [vmem:[%s3961_s1] sm:$0xff]  ;;  %s2984_s28 = smul.u32 192, %s3967_s19  ;;  %v2935_v19 = vld [vmem:[%s3963_s3 + $0x8] sm:$0xff]  ;;  %v2937_v23 = vld [vmem:[%s3963_s3 + $0x18] sm:$0xff]  ;;  %s2933_s21 = sshll.u32 %s3967_s19, 6 }
   0xd   : > { %529 = vmatpush.bf16.msra.mxu1 %v2935_v19  ;;  %v2934_v21 = vld [vmem:[%s3963_s3] sm:$0xff]  ;;  %v2939_v24 = vld [vmem:[%s3963_s3 + $0x28] sm:$0xff]  ;;  %607 = vmatpush.bf16.msra.mxu2 %v2937_v23  ;;  %v2936_v28 = vld [vmem:[%s3963_s3 + $0x10] sm:$0xff]  ;;  %s3927_s24 = scalar_lea.vmem %s3965_s5, %s2933_s21 }
   0xe   : > { %344 = vmatpush.msra.mxu0 %v252_v1  ;;  %s3059_s6 = scalar_lea.vmem %s3960_s0, %s2984_s28  ;;  %v3102_v22 = vld [vmem:[%s3962_s2] ss:$0 sm:$0xff]  ;;  %685 = vmatpush.bf16.msra.mxu3 %v2939_v24  ;;  %v2953_v42 = vld [vmem:[%s3963_s3 + $0x98] sm:$0xff]  ;;  %v2952_v47 = vld [vmem:[%s3963_s3 + $0x90] sm:$0xff] }
   0xf   : > { %v226_v4 = vld [vmem:[%s3059_s6] sm:$0xff]  ;;  %v227_v5 = vld [vmem:[%s3059_s6 + $0x8] sm:$0xff]  ;;  %v228_v6 = vld [vmem:[%s3059_s6 + $0x10] sm:$0xff] }
  0x10   : > { %345 = vmatpush.msra.mxu0 %v251_v2  ;;  %v229_v7 = vld [vmem:[%s3059_s6 + $0x18] sm:$0xff]  ;;  %v230_v8 = vld [vmem:[%s3059_s6 + $0x20] sm:$0xff]  ;;  %v231_v9 = vld [vmem:[%s3059_s6 + $0x28] sm:$0xff] }
  0x11   : > { %v232_v10 = vld [vmem:[%s3059_s6 + $0x30] sm:$0xff]  ;;  %v233_v11 = vld [vmem:[%s3059_s6 + $0x38] sm:$0xff]  ;;  %v234_v12 = vld [vmem:[%s3059_s6 + $0x40] sm:$0xff]  ;;  %530 = vmatpush.bf16.msra.mxu1 %v2934_v21  ;;  %608 = vmatpush.bf16.msra.mxu2 %v2936_v28 }
  0x12   : > { %346 = vmatpush.msra.mxu0 %v250_v3  ;;  %v235_v13 = vld [vmem:[%s3059_s6 + $0x48] sm:$0xff]  ;;  %v236_v14 = vld [vmem:[%s3059_s6 + $0x50] sm:$0xff]  ;;  %v237_v15 = vld [vmem:[%s3059_s6 + $0x58] sm:$0xff] }
  0x13   : > { %2511 = vmatmul.msk.f32.vlgmr.msra.gmra.mxu0 %vm258_vm0, %v226_v4  ;;  %v238_v16 = vld [vmem:[%s3059_s6 + $0x60] sm:$0xff]  ;;  %v239_v17 = vld [vmem:[%s3059_s6 + $0x68] sm:$0xff]  ;;  %v240_v18 = vld [vmem:[%s3059_s6 + $0x70] sm:$0xff] }
  0x14   : > { %v241_v20 = vld [vmem:[%s3059_s6 + $0x78] sm:$0xff]  ;;  %v242_v26 = vld [vmem:[%s3059_s6 + $0x80] sm:$0xff]  ;;  %v243_v32 = vld [vmem:[%s3059_s6 + $0x88] sm:$0xff]  ;;  %1231 = vmatpush.bf16.msrb.mxu0 %v2953_v42 }
  0x15   : > { %v2938_v29 = vld [vmem:[%s3963_s3 + $0x20] sm:$0xff]  ;;  %v244_v36 = vld [vmem:[%s3059_s6 + $0x90] sm:$0xff]  ;;  %v245_v40 = vld [vmem:[%s3059_s6 + $0x98] sm:$0xff] }
  0x16   : > { %686 = vmatpush.bf16.msra.mxu3 %v2938_v29  ;;  %v246_v49 = vld [vmem:[%s3059_s6 + $0xa0] sm:$0xff]  ;;  %v247_v59 = vld [vmem:[%s3059_s6 + $0xa8] sm:$0xff]  ;;  %v248_v1 = vld [vmem:[%s3059_s6 + $0xb0] sm:$0xff] }
  0x17   : > { %v2942_v42 = vld [vmem:[%s3963_s3 + $0x40] sm:$0xff] }
  0x18   : > { %1232 = vmatpush.bf16.msrb.mxu0 %v2952_v47 }
  0x1b   : > { %2512 = vmatmul.msk.f32.gmra.mxu0 %vm258_vm0, %v227_v5 }
  0x23   : > { %2513 = vmatmul.msk.f32.gmra.mxu0 %vm258_vm0, %v228_v6  ;;  %v2943_v6 = vld [vmem:[%s3963_s3 + $0x48] sm:$0xff] }
  0x24   : > { %841 = vmatpush.bf16.msrb.mxu2 %v2943_v6 }
  0x28   : > { %842 = vmatpush.bf16.msrb.mxu2 %v2942_v42 }
  0x2b   : > { %2514 = vmatmul.msk.f32.gmra.mxu0 %vm258_vm0, %v229_v7 }
  0x33   : > { %2515 = vmatmul.msk.f32.gmra.mxu0 %vm258_vm0, %v230_v8 }
  0x3b   : > { %2516 = vmatmul.msk.f32.gmra.mxu0 %vm258_vm0, %v231_v9 }
  0x43   : > { %2517 = vmatmul.msk.f32.gmra.mxu0 %vm258_vm0, %v232_v10  ;;  %v249_v10 = vld [vmem:[%s3059_s6 + $0xb8] sm:$0xff] }
  0x4b   : > { %2518 = vmatmul.msk.f32.gmra.mxu0 %vm258_vm0, %v233_v11 }
  0x53   : > { %2519 = vmatmul.msk.f32.gmra.mxu0 %vm258_vm0, %v234_v12 }
  0x5b   : > { %2520 = vmatmul.msk.f32.gmra.mxu0 %vm258_vm0, %v235_v13 }
  0x63   : > { %2521 = vmatmul.msk.f32.gmra.mxu0 %vm258_vm0, %v236_v14 }
  0x6b   : > { %2522 = vmatmul.msk.f32.gmra.mxu0 %vm258_vm0, %v237_v15  ;;  %v2945_v15 = vld [vmem:[%s3963_s3 + $0x58] sm:$0xff] }
  0x6c   : > { %919 = vmatpush.bf16.msrb.mxu3 %v2945_v15 }
  0x73   : > { %2523 = vmatmul.msk.f32.gmra.mxu0 %vm258_vm0, %v238_v16  ;;  %v2941_v16 = vld [vmem:[%s3963_s3 + $0x38] sm:$0xff] }
  0x74   : > { %763 = vmatpush.bf16.msrb.mxu1 %v2941_v16 }
  0x7b   : > { %2524 = vmatmul.msk.f32.gmra.mxu0 %vm258_vm0, %v239_v17 }
  0x83   : > { %2525 = vmatmul.msk.f32.gmra.mxu0 %vm258_vm0, %v240_v18 }
  0x8b   : > { %2526 = vmatmul.msk.f32.gmra.mxu0 %vm258_vm0, %v241_v20 }
  0x90   : > { %v348_v25 = vpop.f32.mrf.mxu0 }
  0x91   : > { %v349_v27 = vadd.f32 %v3102_v22, %v348_v25 }
  0x93   : > { %v420_v30 = vmax.f32 %v349_v27, 0.0  ;;  %2527 = vmatmul.msk.f32.gmra.mxu0 %vm258_vm0, %v242_v26 }
  0x95   : > { %444 = vst.msk [vmem:[#allocation2] sm:$0xff] %vm258_vm0, %v420_v30 }
  0x98   : > { %v351_v31 = vpop.f32.mrf.mxu0 }
  0x99   : > { %v352_v33 = vadd.f32 %v3102_v22, %v351_v31 }
  0x9b   : > { %v421_v34 = vmax.f32 %v352_v33, 0.0  ;;  %2528 = vmatmul.msk.f32.gmra.mxu0 %vm258_vm0, %v243_v32 }
  0x9c   : > { %v483_v44 = vld [vmem:[#allocation2] sm:$0xff] }
  0x9d   : > { %445 = vst.msk [vmem:[#allocation2 + $0x8] sm:$0xff] %vm258_vm0, %v421_v34 }
  0xa0   : > { %v354_v35 = vpop.f32.mrf.mxu0 }
  0xa1   : > { %v355_v37 = vadd.f32 %v3102_v22, %v354_v35 }
  0xa3   : > { %v422_v38 = vmax.f32 %v355_v37, 0.0  ;;  %2529 = vmatmul.msk.f32.gmra.mxu0 %vm258_vm0, %v244_v36 }
  0xa4   : > { %v560_v52 = vld [vmem:[#allocation2 + $0x1] sm:$0xff] }
  0xa5   : > { %447 = vst.msk [vmem:[#allocation2 + $0x10] sm:$0xff] %vm258_vm0, %v422_v38  ;;  %v638_v54 = vld [vmem:[#allocation2 + $0x2] sm:$0xff] }
  0xa8   : > { %v357_v39 = vpop.f32.mrf.mxu0 }
  0xa9   : > { %v358_v41 = vadd.f32 %v3102_v22, %v357_v39 }
  0xab   : > { %v423_v43 = vmax.f32 %v358_v41, 0.0  ;;  %2530 = vmatmul.msk.f32.gmra.mxu0 %vm258_vm0, %v245_v40 }
  0xac   : > { %v3134_v45 = vld [vmem:[#allocation2 + $0x10] sm:$0xff] }
  0xad   : > { %448 = vst.msk [vmem:[#allocation2 + $0x18] sm:$0xff] %vm258_vm0, %v423_v43  ;;  %v491_v46 = vpack.c.bf16 %v3134_v45, %v483_v44 }
  0xaf   : > { %2543 = vmatmul.msk.bf16.vlgmr.msra.gmra.mxu1 %vm258_vm0, %v491_v46 }
  0xb0   : > { %v360_v48 = vpop.f32.mrf.mxu0 }
  0xb1   : > { %v361_v50 = vadd.f32 %v3102_v22, %v360_v48 }
  0xb3   : > { %v424_v51 = vmax.f32 %v361_v50, 0.0  ;;  %2531 = vmatmul.msk.f32.gmra.mxu0 %vm258_vm0, %v246_v49 }
  0xb4   : > { %v3145_v53 = vld [vmem:[#allocation2 + $0x11] sm:$0xff] }
  0xb5   : > { %v3147_v55 = vld [vmem:[#allocation2 + $0x12] sm:$0xff]  ;;  %450 = vst.msk [vmem:[#allocation2 + $0x20] sm:$0xff] %vm258_vm0, %v424_v51  ;;  %v568_v56 = vpack.c.bf16 %v3145_v53, %v560_v52 }
  0xb6   : > { %v646_v57 = vpack.c.bf16 %v3147_v55, %v638_v54  ;;  %v3197_v19 = vld [vmem:[#allocation2 + $0x14] sm:$0xff] }
  0xb7   : > { %2559 = vmatmul.msk.bf16.vlgmr.msra.gmra.mxu2 %vm258_vm0, %v568_v56  ;;  %v2944_v51 = vld [vmem:[%s3963_s3 + $0x50] sm:$0xff] }
  0xb8   : > { %2575 = vmatmul.msk.bf16.vlgmr.msra.gmra.mxu3 %vm258_vm0, %v646_v57  ;;  %v363_v58 = vpop.f32.mrf.mxu0  ;;  %v2940_v52 = vld [vmem:[%s3963_s3 + $0x30] sm:$0xff] }
  0xb9   : > { %v364_v60 = vadd.f32 %v3102_v22, %v363_v58  ;;  %920 = vmatpush.bf16.msrb.mxu3 %v2944_v51  ;;  %764 = vmatpush.bf16.msrb.mxu1 %v2940_v52 }
  0xbb   : > { %v425_v61 = vmax.f32 %v364_v60, 0.0  ;;  %2532 = vmatmul.msk.f32.gmra.mxu0 %vm258_vm0, %v247_v59 }
  0xbc   : > { %v3157_v62 = vld [vmem:[#allocation2 + $0x20] sm:$0xff] }
  0xbd   : > { %451 = vst.msk [vmem:[#allocation2 + $0x28] sm:$0xff] %vm258_vm0, %v425_v61  ;;  %v880_v63 = vpack.c.bf16 %v3157_v62, %v3134_v45 }
  0xc0   : > { %v366_v0 = vpop.f32.mrf.mxu0 }
  0xc1   : > { %v367_v2 = vadd.f32 %v3102_v22, %v366_v0 }
  0xc3   : > { %v426_v3 = vmax.f32 %v367_v2, 0.0  ;;  %2533 = vmatmul.msk.f32.gmra.mxu0 %vm258_vm0, %v248_v1 }
  0xc4   : > { %v3165_v4 = vld [vmem:[#allocation2 + $0x21] sm:$0xff] }
  0xc5   : > { %v3167_v5 = vld [vmem:[#allocation2 + $0x22] sm:$0xff]  ;;  %453 = vst.msk [vmem:[#allocation2 + $0x30] sm:$0xff] %vm258_vm0, %v426_v3  ;;  %v958_v7 = vpack.c.bf16 %v3165_v4, %v3145_v53  ;;  %v2956_v53 = vld [vmem:[%s3963_s3 + $0xb0] sm:$0xff] }
  0xc6   : > { %v1036_v8 = vpack.c.bf16 %v3167_v5, %v3147_v55  ;;  %v3193_v17 = vld [vmem:[#allocation2 + $0x24] sm:$0xff] }
  0xc7   : > { %v1192_v21 = vpack.c.bf16 %v3193_v17, %v3197_v19 }
  0xc8   : > { %v369_v9 = vpop.f32.mrf.mxu0 }
  0xc9   : > { %v370_v11 = vadd.f32 %v3102_v22, %v369_v9 }
  0xcb   : > { %v427_v12 = vmax.f32 %v370_v11, 0.0  ;;  %2534 = vmatmul.msk.f32.gmra.mxu0 %vm258_vm0, %v249_v10 }
  0xcc   : > { %v3180_v13 = vld [vmem:[#allocation2 + $0x30] sm:$0xff] }
  0xcd   : > { %454 = vst.msk [vmem:[#allocation2 + $0x38] sm:$0xff] %vm258_vm0, %v427_v12  ;;  %v3185_v14 = vpack.c.bf16 %v3180_v13, %v3157_v62  ;;  %v2950_v62 = vld [vmem:[%s3963_s3 + $0x80] sm:$0xff] }
  0xcf   : > { %2544 = vmatmul.msk.bf16.gmra.mxu1 %vm258_vm0, %v3185_v14 }
  0xd0   : > { %v372_v18 = vpop.f32.mrf.mxu0 }
  0xd1   : > { %v373_v20 = vadd.f32 %v3102_v22, %v372_v18 }
  0xd3   : > { %v428_v23 = vmax.f32 %v373_v20, 0.0  ;;  %2687 = vmatmul.msk.bf16.vlgmr.msrb.gmra.mxu0 %vm258_vm0, %v1192_v21 }
  0xd4   : > { %v3203_v24 = vld [vmem:[#allocation2 + $0x31] sm:$0xff] }
  0xd5   : > { %v641_v25 = vld [vmem:[#allocation2 + $0x32] sm:$0xff]  ;;  %456 = vst.msk [vmem:[#allocation2 + $0x40] sm:$0xff] %vm258_vm0, %v428_v23  ;;  %v3210_v27 = vpack.c.bf16 %v3203_v24, %v3165_v4  ;;  %v2958_v4 = vld [vmem:[%s3963_s3 + $0xc0] sm:$0xff] }
  0xd6   : > { %v3205_v26 = vld [vmem:[#allocation2 + $0x34] sm:$0xff]  ;;  %v3213_v28 = vpack.c.bf16 %v641_v25, %v3167_v5 }
  0xd7   : > { %v803_v29 = vpack.c.bf16 %v3205_v26, %v3193_v17  ;;  %2560 = vmatmul.msk.bf16.gmra.mxu2 %vm258_vm0, %v3210_v27  ;;  %v2949_v23 = vld [vmem:[%s3963_s3 + $0x78] sm:$0xff] }
  0xd8   : > { %2576 = vmatmul.msk.bf16.gmra.mxu3 %vm258_vm0, %v3213_v28  ;;  %v375_v30 = vpop.f32.mrf.mxu0  ;;  %1075 = vmatpush.bf16.msra.mxu2 %v2949_v23 }
  0xd9   : > { %v376_v31 = vadd.f32 %v3102_v22, %v375_v30 }
  0xdb   : > { %v429_v32 = vmax.f32 %v376_v31, 0.0 }
  0xdc   : > { %v3222_v33 = vld [vmem:[#allocation2 + $0x40] sm:$0xff] }
  0xdd   : > { %457 = vst.msk [vmem:[#allocation2 + $0x48] sm:$0xff] %vm258_vm0, %v429_v32  ;;  %v881_v34 = vpack.c.bf16 %v3222_v33, %v3180_v13 }
  0xe0   : > { %v378_v35 = vpop.f32.mrf.mxu0 }
  0xe1   : > { %v379_v36 = vadd.f32 %v3102_v22, %v378_v35 }
  0xe3   : > { %v430_v37 = vmax.f32 %v379_v36, 0.0 }
  0xe4   : > { %v3228_v38 = vld [vmem:[#allocation2 + $0x44] sm:$0xff] }
  0xe5   : > { %v3230_v39 = vld [vmem:[#allocation2 + $0x41] sm:$0xff]  ;;  %459 = vst.msk [vmem:[#allocation2 + $0x50] sm:$0xff] %vm258_vm0, %v430_v37  ;;  %v1193_v41 = vpack.c.bf16 %v3228_v38, %v3205_v26 }
  0xe6   : > { %v642_v40 = vld [vmem:[#allocation2 + $0x42] sm:$0xff]  ;;  %v959_v43 = vpack.c.bf16 %v3230_v39, %v3203_v24 }
  0xe7   : > { %v3240_v44 = vpack.c.bf16 %v642_v40, %v641_v25  ;;  %2688 = vmatmul.msk.bf16.gmra.mxu0 %vm258_vm0, %v1193_v41  ;;  %v2951_v37 = vld [vmem:[%s3963_s3 + $0x88] sm:$0xff]  ;;  %v2961_v41 = vld [vmem:[%s3963_s3 + $0xd8] sm:$0xff] }
  0xe8   : > { %v381_v46 = vpop.f32.mrf.mxu0  ;;  %1153 = vmatpush.bf16.msra.mxu3 %v2951_v37  ;;  %1543 = vmatpush.bf16.msra.mxu0 %v2961_v41  ;;  %v2948_v37 = vld [vmem:[%s3963_s3 + $0x70] sm:$0xff] }
  0xe9   : > { %v382_v47 = vadd.f32 %v3102_v22, %v381_v46  ;;  %1076 = vmatpush.bf16.msra.mxu2 %v2948_v37 }
  0xeb   : > { %v431_v48 = vmax.f32 %v382_v47, 0.0 }
  0xec   : > { %v3244_v49 = vld [vmem:[#allocation2 + $0x50] sm:$0xff]  ;;  %1154 = vmatpush.bf16.msra.mxu3 %v2950_v62  ;;  %v2959_v62 = vld [vmem:[%s3963_s3 + $0xc8] sm:$0xff] }
  0xed   : > { %460 = vst.msk [vmem:[#allocation2 + $0x58] sm:$0xff] %vm258_vm0, %v431_v48  ;;  %v3249_v50 = vpack.c.bf16 %v3244_v49, %v3222_v33  ;;  %v2960_v48 = vld [vmem:[%s3963_s3 + $0xd0] sm:$0xff] }
  0xee   : > { %1544 = vmatpush.bf16.msra.mxu0 %v2960_v48 }
  0xef   : > { %2545 = vmatmul.msk.bf16.gmra.mxu1 %vm258_vm0, %v3249_v50 }
  0xf0   : > { %v384_v54 = vpop.f32.mrf.mxu0 }
  0xf1   : > { %v385_v56 = vadd.f32 %v3102_v22, %v384_v54 }
  0xf3   : > { %v432_v57 = vmax.f32 %v385_v56, 0.0 }
  0xf4   : > { %v3260_v58 = vld [vmem:[#allocation2 + $0x51] sm:$0xff] }
  0xf5   : > { %v643_v59 = vld [vmem:[#allocation2 + $0x52] sm:$0xff]  ;;  %462 = vst.msk [vmem:[#allocation2 + $0x60] sm:$0xff] %vm258_vm0, %v432_v57  ;;  %v3267_v61 = vpack.c.bf16 %v3260_v58, %v3230_v39 }
  0xf6   : > { %v3262_v60 = vld [vmem:[#allocation2 + $0x54] sm:$0xff]  ;;  %v3269_v0 = vpack.c.bf16 %v643_v59, %v642_v40  ;;  %v2947_v40 = vld [vmem:[%s3963_s3 + $0x68] sm:$0xff] }
  0xf7   : > { %v804_v1 = vpack.c.bf16 %v3262_v60, %v3228_v38  ;;  %2561 = vmatmul.msk.bf16.gmra.mxu2 %vm258_vm0, %v3267_v61  ;;  %997 = vmatpush.bf16.msra.mxu1 %v2947_v40 }
  0xf8   : > { %2577 = vmatmul.msk.bf16.gmra.mxu3 %vm258_vm0, %v3269_v0  ;;  %v387_v2 = vpop.f32.mrf.mxu0 }
  0xf9   : > { %v388_v3 = vadd.f32 %v3102_v22, %v387_v2  ;;  %v3337_v2 = vld [vmem:[#allocation2 + $0x13] sm:$0xff] }
  0xfb   : > { %v433_v6 = vmax.f32 %v388_v3, 0.0 }
  0xfc   : > { %v3296_v32 = vld [vmem:[#allocation2 + $0x60] sm:$0xff] }
  0xfd   : > { %463 = vst.msk [vmem:[#allocation2 + $0x68] sm:$0xff] %vm258_vm0, %v433_v6  ;;  %v716_v6 = vld [vmem:[#allocation2 + $0x3] sm:$0xff] }
 0x100   : > { %v390_v9 = vpop.f32.mrf.mxu0 }
 0x101   : > { %v391_v10 = vadd.f32 %v3102_v22, %v390_v9  ;;  %v724_v9 = vpack.c.bf16 %v3337_v2, %v716_v6 }
 0x103   : > { %v434_v11 = vmax.f32 %v391_v10, 0.0 }
 0x104   : > { %v3280_v12 = vld [vmem:[#allocation2 + $0x64] sm:$0xff] }
 0x105   : > { %v3282_v15 = vld [vmem:[#allocation2 + $0x61] sm:$0xff]  ;;  %465 = vst.msk [vmem:[#allocation2 + $0x70] sm:$0xff] %vm258_vm0, %v434_v11  ;;  %v1194_v18 = vpack.c.bf16 %v3280_v12, %v3262_v60 }
 0x106   : > { %v644_v16 = vld [vmem:[#allocation2 + $0x62] sm:$0xff]  ;;  %v960_v20 = vpack.c.bf16 %v3282_v15, %v3260_v58 }
 0x107   : > { %v3289_v21 = vpack.c.bf16 %v644_v16, %v643_v59  ;;  %2689 = vmatmul.msk.bf16.gmra.mxu0 %vm258_vm0, %v1194_v18  ;;  %v794_v18 = vld [vmem:[#allocation2 + $0x4] sm:$0xff] }
 0x108   : > { %v393_v25 = vpop.f32.mrf.mxu0  ;;  %v2967_v58 = vld [vmem:[%s3963_s3 + $0x108] sm:$0xff] }
 0x109   : > { %v394_v30 = vadd.f32 %v3102_v22, %v393_v25 }
 0x10b   : > { %v435_v31 = vmax.f32 %v394_v30, 0.0  ;;  %v802_v30 = vpack.c.bf16 %v3197_v19, %v794_v18  ;;  %v3361_v19 = vld [vmem:[#allocation2 + $0x33] sm:$0xff] }
 0x10c   : > { %v3298_v35 = vld [vmem:[#allocation2 + $0x70] sm:$0xff] }
 0x10d   : > { %466 = vst.msk [vmem:[#allocation2 + $0x78] sm:$0xff] %vm258_vm0, %v435_v31  ;;  %v3303_v36 = vpack.c.bf16 %v3298_v35, %v3296_v32 }
 0x10f   : > { %2546 = vmatmul.msk.bf16.gmra.mxu1 %vm258_vm0, %v3303_v36 }
 0x110   : > { %v396_v42 = vpop.f32.mrf.mxu0 }
 0x111   : > { %v397_v46 = vadd.f32 %v3102_v22, %v396_v42 }
 0x113   : > { %v436_v47 = vmax.f32 %v397_v46, 0.0  ;;  %v3363_v46 = vld [vmem:[#allocation2 + $0x23] sm:$0xff] }
 0x114   : > { %v3320_v51 = vld [vmem:[#allocation2 + $0x71] sm:$0xff]  ;;  %v725_v45 = vpack.c.bf16 %v3361_v19, %v3363_v46 }
 0x115   : > { %v3322_v52 = vld [vmem:[#allocation2 + $0x72] sm:$0xff]  ;;  %468 = vst.msk [vmem:[#allocation2 + $0x80] sm:$0xff] %vm258_vm0, %v436_v47  ;;  %v3327_v54 = vpack.c.bf16 %v3320_v51, %v3282_v15 }
 0x116   : > { %v3330_v56 = vpack.c.bf16 %v3322_v52, %v644_v16  ;;  %v3343_v23 = vld [vmem:[#allocation2 + $0x74] sm:$0xff] }
 0x117   : > { %2562 = vmatmul.msk.bf16.gmra.mxu2 %vm258_vm0, %v3327_v54 }
 0x118   : > { %2578 = vmatmul.msk.bf16.gmra.mxu3 %vm258_vm0, %v3330_v56  ;;  %v399_v57 = vpop.f32.mrf.mxu0 }
 0x119   : > { %v400_v59 = vadd.f32 %v3102_v22, %v399_v57 }
 0x11b   : > { %v437_v3 = vmax.f32 %v400_v59, 0.0  ;;  %v3379_v59 = vld [vmem:[%s3964_s4] ss:$0 sm:$0xff] }
 0x11d   : > { %469 = vst.msk [vmem:[#allocation2 + $0x88] sm:$0xff] %vm258_vm0, %v437_v3 }
 0x11f   : > { %2591 = vmatmul.msk.bf16.vlgmr.msrb.gmra.mxu1 %vm258_vm0, %v724_v9 }
 0x120   : > { %v402_v10 = vpop.f32.mrf.mxu0 }
 0x121   : > { %v403_v11 = vadd.f32 %v3102_v22, %v402_v10 }
 0x123   : > { %v438_v16 = vmax.f32 %v403_v11, 0.0 }
 0x124   : > { %v3345_v25 = vld [vmem:[#allocation2 + $0x84] sm:$0xff] }
 0x125   : > { %471 = vst.msk [vmem:[#allocation2 + $0x90] sm:$0xff] %vm258_vm0, %v438_v16  ;;  %v1195_v31 = vpack.c.bf16 %v3345_v25, %v3343_v23  ;;  %v3393_v16 = vld [vmem:[#allocation2 + $0x53] sm:$0xff] }
 0x127   : > { %2607 = vmatmul.msk.bf16.vlgmr.msrb.gmra.mxu2 %vm258_vm0, %v802_v30  ;;  %2690 = vmatmul.msk.bf16.gmra.mxu0 %vm258_vm0, %v1195_v31  ;;  %v3395_v31 = vld [vmem:[#allocation2 + $0x43] sm:$0xff] }
 0x128   : > { %2623 = vmatmul.msk.bf16.vlgmr.msrb.gmra.mxu3 %vm258_vm0, %v880_v63  ;;  %v405_v40 = vpop.f32.mrf.mxu0  ;;  %v2946_v63 = vld [vmem:[%s3963_s3 + $0x60] sm:$0xff] }
 0x129   : > { %v406_v41 = vadd.f32 %v3102_v22, %v405_v40  ;;  %998 = vmatpush.bf16.msra.mxu1 %v2946_v63  ;;  %1465 = vmatpush.bf16.msrb.mxu3 %v2959_v62 }
 0x12b   : > { %v439_v42 = vmax.f32 %v406_v41, 0.0  ;;  %v882_v41 = vpack.c.bf16 %v3296_v32, %v3244_v49  ;;  %v2955_v49 = vld [vmem:[%s3963_s3 + $0xa8] sm:$0xff] }
 0x12c   : > { %v532_v3 = vpop.f32.mrf.mxu1 }
 0x12d   : > { %472 = vst.msk [vmem:[#allocation2 + $0x98] sm:$0xff] %vm258_vm0, %v439_v42  ;;  %v552_v9 = vadd.f32 %v3379_v59, %v532_v3  ;;  %v2957_v42 = vld [vmem:[%s3963_s3 + $0xb8] sm:$0xff]  ;;  %1309 = vmatpush.bf16.msrb.mxu1 %v2955_v49  ;;  %1466 = vmatpush.bf16.msrb.mxu3 %v2958_v4 }
 0x12e   : > { %1387 = vmatpush.bf16.msrb.mxu2 %v2957_v42 }
 0x12f   : > { %2592 = vmatmul.msk.bf16.gmra.mxu1 %vm258_vm0, %v725_v45 }
 0x130   : > { %v408_v47 = vpop.f32.mrf.mxu0 }
 0x131   : > { %v409_v48 = vadd.f32 %v3102_v22, %v408_v47  ;;  %v3425_v47 = vld [vmem:[#allocation2 + $0x63] sm:$0xff] }
 0x132   : > { %1388 = vmatpush.bf16.msrb.mxu2 %v2956_v53 }
 0x133   : > { %v440_v57 = vmax.f32 %v409_v48, 0.0 }
 0x135   : > { %474 = vst.msk [vmem:[#allocation2 + $0xa0] sm:$0xff] %vm258_vm0, %v440_v57  ;;  %v3430_v57 = vpop.f32.mrf.mxu1 }
 0x137   : > { %2608 = vmatmul.msk.bf16.gmra.mxu2 %vm258_vm0, %v803_v29  ;;  %2751 = vmatmul.msk.bf16.vlgmr.msra.gmra.mxu0 %vm258_vm0, %v725_v45  ;;  %v726_v29 = vpack.c.bf16 %v3393_v16, %v3395_v31 }
 0x138   : > { %2624 = vmatmul.msk.bf16.gmra.mxu3 %vm258_vm0, %v881_v34  ;;  %v411_v6 = vpop.f32.mrf.mxu0 }
 0x139   : > { %v412_v10 = vadd.f32 %v3102_v22, %v411_v6  ;;  %v3438_v6 = vld [vmem:[#allocation2 + $0x80] sm:$0xff] }
 0x13a   : > { %v610_v11 = vpop.f32.mrf.mxu2 }
 0x13b   : > { %v441_v18 = vmax.f32 %v412_v10, 0.0  ;;  %v630_v30 = vadd.f32 %v610_v11, %v552_v9  ;;  %v688_v17 = vpop.f32.mrf.mxu3  ;;  %v2968_v9 = vld [vmem:[%s3963_s3 + $0x110] sm:$0xff]  ;;  %v805_v11 = vpack.c.bf16 %v3343_v23, %v3280_v12 }
 0x13c   : > { %v3459_v12 = vld [vmem:[#allocation2 + $0x93] sm:$0xff] }
 0x13d   : > { %475 = vst.msk [vmem:[#allocation2 + $0xa8] sm:$0xff] %vm258_vm0, %v441_v18  ;;  %v3398_v13 = vadd.f32 %v688_v17, %v630_v30  ;;  %v883_v18 = vpack.c.bf16 %v3438_v6, %v3298_v35  ;;  %v1114_v35 = vpack.c.bf16 %v3363_v46, %v3337_v2  ;;  %v1115_v2 = vpack.c.bf16 %v3395_v31, %v3361_v19 }
 0x13f   : > { %2593 = vmatmul.msk.bf16.gmra.mxu1 %vm258_vm0, %v726_v29 }
 0x140   : > { %v414_v34 = vpop.f32.mrf.mxu0 }
 0x141   : > { %v415_v37 = vadd.f32 %v3102_v22, %v414_v34 }
 0x142   : > { %v3436_v3 = vpop.f32.mrf.mxu2 }
 0x143   : > { %v442_v40 = vmax.f32 %v415_v37, 0.0  ;;  %v3443_v10 = vpop.f32.mrf.mxu3 }
 0x145   : > { %477 = vst.msk [vmem:[#allocation2 + $0xb0] sm:$0xff] %vm258_vm0, %v442_v40 }
 0x147   : > { %2609 = vmatmul.msk.bf16.gmra.mxu2 %vm258_vm0, %v804_v1  ;;  %2752 = vmatmul.msk.bf16.gmra.mxu0 %vm258_vm0, %v726_v29  ;;  %v3423_v1 = vld [vmem:[#allocation2 + $0x73] sm:$0xff] }
 0x148   : > { %2625 = vmatmul.msk.bf16.gmra.mxu3 %vm258_vm0, %v882_v41  ;;  %v417_v45 = vpop.f32.mrf.mxu0  ;;  %v727_v48 = vpack.c.bf16 %v3423_v1, %v3425_v47  ;;  %v1502_v41 = vld [vmem:[#allocation2 + $0x83] sm:$0xff] }
 0x149   : > { %v418_v38 = vadd.f32 %v3102_v22, %v417_v45  ;;  %v2969_v22 = vld [vmem:[%s3963_s3 + $0x118] sm:$0xff]  ;;  %v1507_v42 = vpack.c.bf16 %v3459_v12, %v1502_v41 }
 0x14a   : > { %1855 = vmatpush.bf16.msrb.mxu0 %v2969_v22 }
 0x14b   : > { %v443_v63 = vmax.f32 %v418_v38, 0.0  ;;  %v1116_v38 = vpack.c.bf16 %v3425_v47, %v3393_v16 }
 0x14c   : > { %v537_v30 = vpop.f32.mrf.mxu1 }
 0x14d   : > { %478 = vst.msk [vmem:[#allocation2 + $0xb8] sm:$0xff] %vm258_vm0, %v443_v63  ;;  %v554_v17 = vadd.f32 %v3379_v59, %v537_v30 }
 0x14e   : > { %1856 = vmatpush.bf16.msrb.mxu0 %v2968_v9 }
 0x14f   : > { %2594 = vmatmul.msk.bf16.gmra.mxu1 %vm258_vm0, %v727_v48 }
 0x154   : > { %v3479_v55 = vpop.f32.mrf.mxu1 }
 0x157   : > { %2610 = vmatmul.msk.bf16.gmra.mxu2 %vm258_vm0, %v805_v11  ;;  %2753 = vmatmul.msk.bf16.gmra.mxu0 %vm258_vm0, %v727_v48  ;;  %v2963_v48 = vld [vmem:[%s3963_s3 + $0xe8] sm:$0xff] }
 0x158   : > { %2626 = vmatmul.msk.bf16.gmra.mxu3 %vm258_vm0, %v883_v18  ;;  %v3536_v11 = vld [vmem:[#allocation2 + $0x82] sm:$0xff] }
 0x159   : > { %v1039_v30 = vpack.c.bf16 %v3536_v11, %v3322_v52 }
 0x15a   : > { %v615_v29 = vpop.f32.mrf.mxu2 }
 0x15b   : > { %v632_v34 = vadd.f32 %v615_v29, %v554_v17  ;;  %v693_v37 = vpop.f32.mrf.mxu3  ;;  %v3544_v17 = vpack.c.bf16 %v1502_v41, %v3423_v1  ;;  %v3557_v41 = vld [vmem:[#allocation2 + $0xa2] sm:$0xff] }
 0x15d   : > { %v3453_v40 = vadd.f32 %v693_v37, %v632_v34 }
 0x15f   : > { %2639 = vmatmul.msk.bf16.vlgmr.msra.gmra.mxu1 %vm258_vm0, %v958_v7  ;;  %v2954_v7 = vld [vmem:[%s3963_s3 + $0xa0] sm:$0xff] }
 0x160   : > { %1310 = vmatpush.bf16.msrb.mxu1 %v2954_v7 }
 0x162   : > { %v3485_v5 = vpop.f32.mrf.mxu2 }
 0x164   : > { %1621 = vmatpush.bf16.msra.mxu1 %v2963_v48 }
 0x167   : > { %2655 = vmatmul.msk.bf16.vlgmr.msra.gmra.mxu2 %vm258_vm0, %v1036_v8  ;;  %2754 = vmatmul.msk.bf16.gmra.mxu0 %vm258_vm0, %v1507_v42  ;;  %v3487_v8 = vpop.f32.mrf.mxu3 }
 0x168   : > { %2671 = vmatmul.msk.bf16.vlgmr.msra.gmra.mxu3 %vm258_vm0, %v1114_v35 }
 0x169   : > { %1777 = vmatpush.bf16.msra.mxu3 %v2967_v58 }
 0x16c   : > { %v542_v46 = vpop.f32.mrf.mxu1 }
 0x16d   : > { %v556_v24 = vadd.f32 %v3379_v59, %v542_v46  ;;  %v3559_v46 = vld [vmem:[#allocation2 + $0x92] sm:$0xff] }
 0x16f   : > { %2640 = vmatmul.msk.bf16.gmra.mxu1 %vm258_vm0, %v959_v43 }
 0x174   : > { %v3503_v19 = vpop.f32.mrf.mxu1 }
 0x177   : > { %2656 = vmatmul.msk.bf16.gmra.mxu2 %vm258_vm0, %v3240_v44  ;;  %2815 = vmatmul.msk.bf16.vlgmr.msrb.gmra.mxu0 %vm258_vm0, %v3240_v44  ;;  %v2965_v44 = vld [vmem:[%s3963_s3 + $0xf8] sm:$0xff] }
 0x178   : > { %2672 = vmatmul.msk.bf16.gmra.mxu3 %vm258_vm0, %v1115_v2  ;;  %1699 = vmatpush.bf16.msra.mxu2 %v2965_v44 }
 0x17a   : > { %v620_v45 = vpop.f32.mrf.mxu2 }
 0x17b   : > { %v634_v43 = vadd.f32 %v620_v45, %v556_v24  ;;  %v698_v62 = vpop.f32.mrf.mxu3  ;;  %v1819_v45 = vpack.c.bf16 %v3557_v41, %v3559_v46 }
 0x17d   : > { %v3497_v49 = vadd.f32 %v698_v62, %v634_v43  ;;  %v553_v62 = vadd.f32 %v3379_v59, %v3430_v57 }
 0x17f   : > { %2641 = vmatmul.msk.bf16.gmra.mxu1 %vm258_vm0, %v960_v20  ;;  %v3518_v20 = vld [vmem:[#allocation2 + $0x81] sm:$0xff] }
 0x180   : > { %v3522_v63 = vpack.c.bf16 %v3518_v20, %v3320_v51  ;;  %v2976_v51 = vld [vmem:[%s3963_s3 + $0x150] sm:$0xff] }
 0x182   : > { %v3532_v22 = vpop.f32.mrf.mxu2 }
 0x183   : > { %v3534_v9 = vpop.f32.mrf.mxu3 }
 0x187   : > { %2657 = vmatmul.msk.bf16.gmra.mxu2 %vm258_vm0, %v3289_v21  ;;  %2816 = vmatmul.msk.bf16.gmra.mxu0 %vm258_vm0, %v3289_v21  ;;  %v2977_v21 = vld [vmem:[%s3963_s3 + $0x158] sm:$0xff] }
 0x188   : > { %2673 = vmatmul.msk.bf16.gmra.mxu3 %vm258_vm0, %v1116_v38  ;;  %2167 = vmatpush.bf16.msra.mxu0 %v2977_v21  ;;  %v3578_v38 = vpop.f32.mrf.mxu0 }
 0x18c   : > { %v547_v16 = vpop.f32.mrf.mxu1  ;;  %2168 = vmatpush.bf16.msra.mxu0 %v2976_v51  ;;  %v2962_v51 = vld [vmem:[%s3963_s3 + $0xe0] sm:$0xff] }
 0x18d   : > { %v558_v29 = vadd.f32 %v3379_v59, %v547_v16  ;;  %1622 = vmatpush.bf16.msra.mxu1 %v2962_v51 }
 0x18f   : > { %2642 = vmatmul.msk.bf16.gmra.mxu1 %vm258_vm0, %v3522_v63 }
 0x194   : > { %v549_v18 = vpop.f32.mrf.mxu1 }
 0x195   : > { %v559_v1 = vadd.f32 %v3379_v59, %v549_v18 }
 0x197   : > { %2658 = vmatmul.msk.bf16.gmra.mxu2 %vm258_vm0, %v1039_v30  ;;  %2817 = vmatmul.msk.bf16.gmra.mxu0 %vm258_vm0, %v1039_v30 }
 0x198   : > { %2674 = vmatmul.msk.bf16.gmra.mxu3 %vm258_vm0, %v3544_v17 }
 0x19a   : > { %v625_v34 = vpop.f32.mrf.mxu2 }
 0x19b   : > { %v703_v37 = vpop.f32.mrf.mxu3  ;;  %v636_v35 = vadd.f32 %v625_v34, %v558_v29 }
 0x19c   : > { %v766_v42 = vpop.f32.mrf.mxu1 }
 0x19d   : > { %v3551_v53 = vadd.f32 %v703_v37, %v636_v35  ;;  %v786_v52 = vadd.f32 %v766_v42, %v3398_v13  ;;  %v2966_v13 = vld [vmem:[%s3963_s3 + $0x100] sm:$0xff] }
 0x19e   : > { %1778 = vmatpush.bf16.msra.mxu3 %v2966_v13 }
 0x19f   : > { %2703 = vmatmul.msk.bf16.vlgmr.msrb.gmra.mxu1 %vm258_vm0, %v3185_v14  ;;  %v2964_v14 = vld [vmem:[%s3963_s3 + $0xf0] sm:$0xff] }
 0x1a0   : > { %1700 = vmatpush.bf16.msra.mxu2 %v2964_v14 }
 0x1a2   : > { %v627_v4 = vpop.f32.mrf.mxu2 }
 0x1a3   : > { %v705_v7 = vpop.f32.mrf.mxu3  ;;  %v637_v2 = vadd.f32 %v627_v4, %v559_v1 }
 0x1a4   : > { %v768_v24 = vpop.f32.mrf.mxu1 }
 0x1a5   : > { %v3563_v43 = vadd.f32 %v705_v7, %v637_v2 }
 0x1a7   : > { %2719 = vmatmul.msk.bf16.vlgmr.msrb.gmra.mxu2 %vm258_vm0, %v3210_v27  ;;  %2818 = vmatmul.msk.bf16.gmra.mxu0 %vm258_vm0, %v1819_v45 }
 0x1a8   : > { %2735 = vmatmul.msk.bf16.vlgmr.msrb.gmra.mxu3 %vm258_vm0, %v3213_v28  ;;  %v631_v28 = vadd.f32 %v3436_v3, %v553_v62  ;;  %v3590_v3 = vpop.f32.mrf.mxu0 }
 0x1aa   : > { %v844_v27 = vpop.f32.mrf.mxu2  ;;  %v709_v57 = vadd.f32 %v3443_v10, %v631_v28 }
 0x1ab   : > { %v922_v44 = vpop.f32.mrf.mxu3  ;;  %v864_v58 = vadd.f32 %v844_v27, %v786_v52 }
 0x1ac   : > { %v771_v16 = vpop.f32.mrf.mxu1  ;;  %v787_v18 = vadd.f32 %v768_v24, %v709_v57 }
 0x1ad   : > { %v3581_v48 = vadd.f32 %v922_v44, %v864_v58  ;;  %v788_v21 = vadd.f32 %v771_v16, %v3453_v40  ;;  %v3629_v44 = vld [vmem:[#allocation2 + $0x90] sm:$0xff] }
 0x1af   : > { %2704 = vmatmul.msk.bf16.gmra.mxu1 %vm258_vm0, %v3249_v50  ;;  %v555_v50 = vadd.f32 %v3379_v59, %v3479_v55 }
 0x1b0   : > { %v3603_v52 = vpop.f32.mrf.mxu0 }
 0x1b1   : > { %v633_v42 = vadd.f32 %v3485_v5, %v555_v50 }
 0x1b2   : > { %v846_v30 = vpop.f32.mrf.mxu2 }
 0x1b3   : > { %v924_v29 = vpop.f32.mrf.mxu3  ;;  %v865_v34 = vadd.f32 %v846_v30, %v787_v18  ;;  %v3647_v30 = vld [vmem:[#allocation2 + $0x91] sm:$0xff] }
 0x1b4   : > { %v773_v37 = vpop.f32.mrf.mxu1  ;;  %v1351_v50 = vpack.c.bf16 %v3647_v30, %v3518_v20 }
 0x1b5   : > { %v3592_v35 = vadd.f32 %v924_v29, %v865_v34 }
 0x1b7   : > { %2720 = vmatmul.msk.bf16.gmra.mxu2 %vm258_vm0, %v3267_v61  ;;  %2879 = vmatmul.msk.bf16.vlgmr.msra.gmra.mxu0 %vm258_vm0, %v3267_v61 }
 0x1b8   : > { %2736 = vmatmul.msk.bf16.gmra.mxu3 %vm258_vm0, %v3269_v0  ;;  %v711_v0 = vadd.f32 %v3487_v8, %v633_v42  ;;  %v3611_v13 = vpop.f32.mrf.mxu0  ;;  %v2973_v8 = vld [vmem:[%s3963_s3 + $0x138] sm:$0xff] }
 0x1b9   : > { %2011 = vmatpush.bf16.msrb.mxu2 %v2973_v8 }
 0x1ba   : > { %v849_v10 = vpop.f32.mrf.mxu2  ;;  %v789_v61 = vadd.f32 %v773_v37, %v711_v0 }
 0x1bb   : > { %v927_v40 = vpop.f32.mrf.mxu3  ;;  %v866_v1 = vadd.f32 %v849_v10, %v788_v21 }
 0x1bc   : > { %v776_v4 = vpop.f32.mrf.mxu1 }
 0x1bd   : > { %v3605_v7 = vadd.f32 %v927_v40, %v866_v1  ;;  %v790_v2 = vadd.f32 %v776_v4, %v3497_v49  ;;  %v557_v49 = vadd.f32 %v3379_v59, %v3503_v19  ;;  %v2971_v59 = vld [vmem:[%s3963_s3 + $0x128] sm:$0xff] }
 0x1be   : > { %1933 = vmatpush.bf16.msrb.mxu1 %v2971_v59  ;;  %v1574_v4 = vld [vmem:[#allocation2 + $0x24] sm:$0xff] }
 0x1bf   : > { %2705 = vmatmul.msk.bf16.gmra.mxu1 %vm258_vm0, %v3303_v36  ;;  %v2975_v36 = vld [vmem:[%s3963_s3 + $0x148] sm:$0xff] }
 0x1c0   : > { %2089 = vmatpush.bf16.msrb.mxu3 %v2975_v36  ;;  %v3632_v16 = vpop.f32.mrf.mxu0  ;;  %v3690_v59 = vld [vmem:[#allocation2 + $0x44] sm:$0xff] }
 0x1c2   : > { %v851_v24 = vpop.f32.mrf.mxu2 }
 0x1c3   : > { %v929_v55 = vpop.f32.mrf.mxu3  ;;  %v867_v45 = vadd.f32 %v851_v24, %v789_v61 }
 0x1c4   : > { %v778_v14 = vpop.f32.mrf.mxu1 }
 0x1c5   : > { %v3613_v5 = vadd.f32 %v929_v55, %v867_v45  ;;  %v1652_v45 = vld [vmem:[#allocation2 + $0x30] sm:$0xff] }
 0x1c7   : > { %2721 = vmatmul.msk.bf16.gmra.mxu2 %vm258_vm0, %v3327_v54  ;;  %2880 = vmatmul.msk.bf16.gmra.mxu0 %vm258_vm0, %v3327_v54  ;;  %v3639_v54 = vpack.c.bf16 %v3629_v44, %v3438_v6 }
 0x1c8   : > { %2737 = vmatmul.msk.bf16.gmra.mxu3 %vm258_vm0, %v3330_v56  ;;  %v635_v56 = vadd.f32 %v3532_v22, %v557_v49  ;;  %v3658_v10 = vpop.f32.mrf.mxu0  ;;  %v1660_v49 = vpack.c.bf16 %v3222_v33, %v1652_v45 }
 0x1ca   : > { %v854_v62 = vpop.f32.mrf.mxu2  ;;  %v713_v19 = vadd.f32 %v3534_v9, %v635_v56  ;;  %v3656_v9 = vpack.c.bf16 %v3559_v46, %v3536_v11  ;;  %v1582_v11 = vpack.c.bf16 %v3205_v26, %v1574_v4  ;;  %v2972_v26 = vld [vmem:[%s3963_s3 + $0x130] sm:$0xff] }
 0x1cb   : > { %v932_v27 = vpop.f32.mrf.mxu3  ;;  %v868_v28 = vadd.f32 %v854_v62, %v790_v2  ;;  %v3676_v62 = vld [vmem:[#allocation2 + $0xa1] sm:$0xff]  ;;  %v2127_v56 = vld [vmem:[#allocation2 + $0xb1] sm:$0xff]  ;;  %2012 = vmatpush.bf16.msrb.mxu2 %v2972_v26 }
 0x1cc   : > { %v781_v58 = vpop.f32.mrf.mxu1  ;;  %v791_v22 = vadd.f32 %v778_v14, %v713_v19  ;;  %v1730_v14 = vld [vmem:[#allocation2 + $0x31] sm:$0xff] }
 0x1cd   : > { %v3634_v21 = vadd.f32 %v932_v27, %v868_v28  ;;  %v792_v51 = vadd.f32 %v781_v58, %v3551_v53  ;;  %v2974_v27 = vld [vmem:[%s3963_s3 + $0x140] sm:$0xff] }
 0x1ce   : > { %2090 = vmatpush.bf16.msrb.mxu3 %v2974_v27 }
 0x1cf   : > { %2706 = vmatmul.msk.bf16.gmra.mxu1 %vm258_vm0, %v3639_v54 }
 0x1d0   : > { %v3668_v46 = vpop.f32.mrf.mxu0 }
 0x1d2   : > { %v856_v57 = vpop.f32.mrf.mxu2 }
 0x1d3   : > { %v934_v18 = vpop.f32.mrf.mxu3  ;;  %v869_v53 = vadd.f32 %v856_v57, %v791_v22  ;;  %v1583_v57 = vpack.c.bf16 %v3262_v60, %v3690_v59 }
 0x1d4   : > { %v783_v29 = vpop.f32.mrf.mxu1 }
 0x1d5   : > { %v3649_v34 = vadd.f32 %v934_v18, %v869_v53  ;;  %v793_v37 = vadd.f32 %v783_v29, %v3563_v43  ;;  %v2970_v18 = vld [vmem:[%s3963_s3 + $0x120] sm:$0xff] }
 0x1d6   : > { %1934 = vmatpush.bf16.msrb.mxu1 %v2970_v18 }
 0x1d7   : > { %2722 = vmatmul.msk.bf16.gmra.mxu2 %vm258_vm0, %v1351_v50  ;;  %2881 = vmatmul.msk.bf16.gmra.mxu0 %vm258_vm0, %v1351_v50 }
 0x1d8   : > { %2738 = vmatmul.msk.bf16.gmra.mxu3 %vm258_vm0, %v3656_v9  ;;  %v3687_v33 = vpop.f32.mrf.mxu0 }
 0x1da   : > { %v859_v40 = vpop.f32.mrf.mxu2 }
 0x1db   : > { %v937_v42 = vpop.f32.mrf.mxu3  ;;  %v870_v1 = vadd.f32 %v859_v40, %v792_v51  ;;  %v3701_v40 = vld [vmem:[#allocation2 + $0x50] sm:$0xff] }
 0x1dc   : > { %v1000_v43 = vpop.f32.mrf.mxu1  ;;  %v1661_v60 = vpack.c.bf16 %v3296_v32, %v3701_v40 }
 0x1dd   : > { %v3664_v2 = vadd.f32 %v937_v42, %v870_v1  ;;  %v1020_v20 = vadd.f32 %v1000_v43, %v3581_v48  ;;  %v1738_v48 = vpack.c.bf16 %v3230_v39, %v1730_v14  ;;  %v1732_v42 = vld [vmem:[#allocation2 + $0x51] sm:$0xff] }
 0x1de   : > { %v1739_v43 = vpack.c.bf16 %v3282_v15, %v1732_v42 }
 0x1df   : > { %2767 = vmatmul.msk.bf16.vlgmr.msra.gmra.mxu1 %vm258_vm0, %v1582_v11 }
 0x1e2   : > { %v861_v0 = vpop.f32.mrf.mxu2 }
 0x1e3   : > { %v939_v61 = vpop.f32.mrf.mxu3  ;;  %v871_v24 = vadd.f32 %v861_v0, %v793_v37 }
 0x1e4   : > { %v1002_v55 = vpop.f32.mrf.mxu1 }
 0x1e5   : > { %v3671_v8 = vadd.f32 %v939_v61, %v871_v24  ;;  %v1021_v36 = vadd.f32 %v1002_v55, %v3592_v35  ;;  %v2131_v35 = vpack.c.bf16 %v2127_v56, %v3676_v62  ;;  %v3711_v61 = vld [vmem:[#allocation2 + $0x64] sm:$0xff]  ;;  %v3735_v56 = vld [vmem:[#allocation2 + $0x94] sm:$0xff] }
 0x1e7   : > { %2783 = vmatmul.msk.bf16.vlgmr.msra.gmra.mxu2 %vm258_vm0, %v1660_v49  ;;  %2882 = vmatmul.msk.bf16.gmra.mxu0 %vm258_vm0, %v2131_v35 }
 0x1e8   : > { %2799 = vmatmul.msk.bf16.vlgmr.msra.gmra.mxu3 %vm258_vm0, %v1738_v48 }
 0x1ea   : > { %v1078_v39 = vpop.f32.mrf.mxu2 }
 0x1eb   : > { %v1156_v28 = vpop.f32.mrf.mxu3  ;;  %v1098_v58 = vadd.f32 %v1078_v39, %v1020_v20 }
 0x1ec   : > { %v1005_v51 = vpop.f32.mrf.mxu1 }
 0x1ed   : > { %v3692_v19 = vadd.f32 %v1156_v28, %v1098_v58  ;;  %v1022_v22 = vadd.f32 %v1005_v51, %v3605_v7  ;;  %v1585_v28 = vpack.c.bf16 %v3735_v56, %v3345_v25  ;;  %v2979_v58 = vld [vmem:[%s3963_s3 + $0x168] sm:$0xff] }
 0x1ee   : > { %2245 = vmatpush.bf16.msra.mxu1 %v2979_v58  ;;  %v3791_v58 = vld [vmem:[#allocation2 + $0x54] sm:$0xff] }
 0x1ef   : > { %2768 = vmatmul.msk.bf16.gmra.mxu1 %vm258_vm0, %v1583_v57  ;;  %v3746_v57 = vld [vmem:[#allocation2 + $0xa0] sm:$0xff] }
 0x1f0   : > { %v1663_v25 = vpack.c.bf16 %v3746_v57, %v3629_v44 }
 0x1f2   : > { %v1080_v53 = vpop.f32.mrf.mxu2 }
 0x1f3   : > { %v1158_v29 = vpop.f32.mrf.mxu3  ;;  %v1099_v37 = vadd.f32 %v1080_v53, %v1021_v36  ;;  %v3719_v36 = vld [vmem:[#allocation2 + $0x70] sm:$0xff] }
 0x1f4   : > { %v1007_v50 = vpop.f32.mrf.mxu1  ;;  %v1662_v26 = vpack.c.bf16 %v3438_v6, %v3719_v36 }
 0x1f5   : > { %v3703_v1 = vadd.f32 %v1158_v29, %v1099_v37  ;;  %v1023_v7 = vadd.f32 %v1007_v50, %v3613_v5  ;;  %v1584_v5 = vpack.c.bf16 %v3343_v23, %v3711_v61  ;;  %v2981_v23 = vld [vmem:[%s3963_s3 + $0x178] sm:$0xff]  ;;  %v1741_v37 = vpack.c.bf16 %v3676_v62, %v3647_v30 }
 0x1f6   : > { %2323 = vmatpush.bf16.msra.mxu2 %v2981_v23  ;;  %v3779_v23 = vld [vmem:[#allocation2 + $0x53] sm:$0xff] }
 0x1f7   : > { %2784 = vmatmul.msk.bf16.gmra.mxu2 %vm258_vm0, %v1661_v60  ;;  %v1254_v60 = vadd.f32 %v3578_v38, %v3692_v19 }
 0x1f8   : > { %2800 = vmatmul.msk.bf16.gmra.mxu3 %vm258_vm0, %v1739_v43 }
 0x1fa   : > { %v1083_v4 = vpop.f32.mrf.mxu2 }
 0x1fb   : > { %v1161_v20 = vpop.f32.mrf.mxu3  ;;  %v1100_v11 = vadd.f32 %v1083_v4, %v1022_v22  ;;  %v1886_v4 = vld [vmem:[#allocation2 + $0x33] sm:$0xff] }
 0x1fc   : > { %v1010_v0 = vpop.f32.mrf.mxu1  ;;  %v1894_v44 = vpack.c.bf16 %v3395_v31, %v1886_v4  ;;  %v2980_v31 = vld [vmem:[%s3963_s3 + $0x170] sm:$0xff] }
 0x1fd   : > { %v3713_v24 = vadd.f32 %v1161_v20, %v1100_v11  ;;  %v1024_v55 = vadd.f32 %v1010_v0, %v3634_v21  ;;  %v2983_v21 = vld [vmem:[%s3963_s3 + $0x188] sm:$0xff]  ;;  %v1255_v0 = vadd.f32 %v3590_v3, %v3703_v1  ;;  %v2982_v3 = vld [vmem:[%s3963_s3 + $0x180] sm:$0xff]  ;;  %2324 = vmatpush.bf16.msra.mxu2 %v2980_v31 }
 0x1fe   : > { %2401 = vmatpush.bf16.msra.mxu3 %v2983_v21 }
 0x1ff   : > { %2769 = vmatmul.msk.bf16.gmra.mxu1 %vm258_vm0, %v1584_v5  ;;  %v1964_v5 = vld [vmem:[#allocation2 + $0x34] sm:$0xff] }
 0x200   : > { %v1972_v19 = vpack.c.bf16 %v3690_v59, %v1964_v5 }
 0x202   : > { %v1085_v15 = vpop.f32.mrf.mxu2  ;;  %2402 = vmatpush.bf16.msra.mxu3 %v2982_v3  ;;  %v3828_v3 = vld [vmem:[#allocation2 + $0xa4] sm:$0xff] }
 0x203   : > { %v1163_v32 = vpop.f32.mrf.mxu3  ;;  %v1101_v45 = vadd.f32 %v1085_v15, %v1023_v7  ;;  %v2042_v15 = vld [vmem:[#allocation2 + $0x40] sm:$0xff] }
 0x204   : > { %v1012_v14 = vpop.f32.mrf.mxu1 }
 0x205   : > { %v3721_v49 = vadd.f32 %v1163_v32, %v1101_v45  ;;  %v1025_v48 = vadd.f32 %v1012_v14, %v3649_v34  ;;  %v2050_v45 = vpack.c.bf16 %v3701_v40, %v2042_v15  ;;  %v1256_v40 = vadd.f32 %v3603_v52, %v3713_v24 }
 0x207   : > { %2785 = vmatmul.msk.bf16.gmra.mxu2 %vm258_vm0, %v1662_v26  ;;  %v1257_v52 = vadd.f32 %v3611_v13, %v3721_v49 }
 0x208   : > { %2801 = vmatmul.msk.bf16.gmra.mxu3 %vm258_vm0, %v3522_v63 }
 0x20a   : > { %v1088_v27 = vpop.f32.mrf.mxu2 }
 0x20b   : > { %v1166_v34 = vpop.f32.mrf.mxu3  ;;  %v1102_v6 = vadd.f32 %v1088_v27, %v1024_v55 }
 0x20c   : > { %v1015_v35 = vpop.f32.mrf.mxu1 }
 0x20d   : > { %v3737_v39 = vadd.f32 %v1166_v34, %v1102_v6  ;;  %v1026_v63 = vadd.f32 %v1015_v35, %v3664_v2  ;;  %v1895_v34 = vpack.c.bf16 %v3425_v47, %v3779_v23  ;;  %v2978_v6 = vld [vmem:[%s3963_s3 + $0x160] sm:$0xff] }
 0x20e   : > { %2246 = vmatpush.bf16.msra.mxu1 %v2978_v6 }
 0x20f   : > { %2770 = vmatmul.msk.bf16.gmra.mxu1 %vm258_vm0, %v1585_v28  ;;  %v1258_v49 = vadd.f32 %v3632_v16, %v3737_v39 }
 0x212   : > { %v1090_v51 = vpop.f32.mrf.mxu2 }
 0x213   : > { %v1168_v22 = vpop.f32.mrf.mxu3  ;;  %v1103_v18 = vadd.f32 %v1090_v51, %v1025_v48  ;;  %v2044_v51 = vld [vmem:[#allocation2 + $0x60] sm:$0xff] }
 0x214   : > { %v1017_v53 = vpop.f32.mrf.mxu1 }
 0x215   : > { %v3748_v29 = vadd.f32 %v1168_v22, %v1103_v18  ;;  %v1027_v2 = vadd.f32 %v1017_v53, %v3671_v8  ;;  %v1973_v18 = vpack.c.bf16 %v3711_v61, %v3791_v58  ;;  %v2051_v53 = vpack.c.bf16 %v3719_v36, %v2044_v51 }
 0x217   : > { %2786 = vmatmul.msk.bf16.gmra.mxu2 %vm258_vm0, %v1663_v25 }
 0x218   : > { %2802 = vmatmul.msk.bf16.gmra.mxu3 %vm258_vm0, %v1741_v37 }
 0x21a   : > { %v1093_v50 = vpop.f32.mrf.mxu2 }
 0x21b   : > { %v1171_v42 = vpop.f32.mrf.mxu3  ;;  %v1104_v7 = vadd.f32 %v1093_v50, %v1026_v63 }
 0x21c   : > { %v1312_v43 = vpop.f32.mrf.mxu1 }
 0x21d   : > { %v3759_v20 = vadd.f32 %v1171_v42, %v1104_v7  ;;  %v1332_v8 = vadd.f32 %v1312_v43, %v1254_v60  ;;  %v3806_v43 = vld [vmem:[#allocation2 + $0x84] sm:$0xff] }
 0x21f   : > { %2831 = vmatmul.msk.bf16.vlgmr.msrb.gmra.mxu1 %vm258_vm0, %v1894_v44  ;;  %v1259_v44 = vadd.f32 %v3658_v10, %v3748_v29  ;;  %v1260_v10 = vadd.f32 %v3668_v46, %v3759_v20 }
 0x222   : > { %v1095_v30 = vpop.f32.mrf.mxu2 }
 0x223   : > { %v1173_v62 = vpop.f32.mrf.mxu3  ;;  %v1105_v11 = vadd.f32 %v1095_v30, %v1027_v2  ;;  %v1546_v2 = vpop.f32.mrf.mxu0 }
 0x224   : > { %v1314_v55 = vpop.f32.mrf.mxu1 }
 0x225   : > { %v3765_v32 = vadd.f32 %v1173_v62, %v1105_v11  ;;  %v1333_v38 = vadd.f32 %v1314_v55, %v1255_v0  ;;  %v3810_v62 = vld [vmem:[#allocation2 + $0x74] sm:$0xff]  ;;  %v3819_v55 = vld [vmem:[#allocation2 + $0xa3] sm:$0xff] }
 0x226   : > { %v1974_v11 = vpack.c.bf16 %v3806_v43, %v3810_v62 }
 0x227   : > { %2847 = vmatmul.msk.bf16.vlgmr.msrb.gmra.mxu2 %vm258_vm0, %v1972_v19 }
 0x228   : > { %2863 = vmatmul.msk.bf16.vlgmr.msrb.gmra.mxu3 %vm258_vm0, %v2050_v45  ;;  %v1897_v45 = vpack.c.bf16 %v3819_v55, %v3459_v12 }
 0x22a   : > { %v1390_v1 = vpop.f32.mrf.mxu2 }
 0x22b   : > { %v1468_v14 = vpop.f32.mrf.mxu3  ;;  %v1410_v48 = vadd.f32 %v1390_v1, %v1332_v8  ;;  %v1548_v4 = vpop.f32.mrf.mxu0  ;;  %v2049_v1 = vld [vmem:[#allocation2 + $0xb0] sm:$0xff] }
 0x22c   : > { %v1317_v26 = vpop.f32.mrf.mxu1  ;;  %v2053_v12 = vpack.c.bf16 %v2049_v1, %v3746_v57 }
 0x22d   : > { %v3781_v21 = vadd.f32 %v1468_v14, %v1410_v48  ;;  %v1334_v27 = vadd.f32 %v1317_v26, %v1256_v40  ;;  %v1261_v48 = vadd.f32 %v3687_v33, %v3765_v32  ;;  %v1975_v26 = vpack.c.bf16 %v3828_v3, %v3735_v56 }
 0x22f   : > { %2832 = vmatmul.msk.bf16.gmra.mxu1 %vm258_vm0, %v1895_v34  ;;  %v1566_v33 = vadd.f32 %v1546_v2, %v3781_v21  ;;  %v2362_v2 = vpack.c.bf16 %v3791_v58, %v3690_v59 }
 0x232   : > { %v1392_v35 = vpop.f32.mrf.mxu2 }
 0x233   : > { %v1470_v63 = vpop.f32.mrf.mxu3  ;;  %v1411_v28 = vadd.f32 %v1392_v35, %v1333_v38  ;;  %v1551_v15 = vpop.f32.mrf.mxu0  ;;  %v2199_v35 = vld [vmem:[#allocation2 + $0x52] sm:$0xff] }
 0x234   : > { %v1319_v24 = vpop.f32.mrf.mxu1 }
 0x235   : > { %v3793_v22 = vadd.f32 %v1470_v63, %v1411_v28  ;;  %v1335_v47 = vadd.f32 %v1319_v24, %v1257_v52  ;;  %v2198_v28 = vld [vmem:[#allocation2 + $0x42] sm:$0xff] }
 0x236   : > { %v2206_v51 = vpack.c.bf16 %v2199_v35, %v2198_v28 }
 0x237   : > { %2848 = vmatmul.msk.bf16.gmra.mxu2 %vm258_vm0, %v1973_v18 }
 0x238   : > { %2864 = vmatmul.msk.bf16.gmra.mxu3 %vm258_vm0, %v2051_v53 }
 0x23a   : > { %v1395_v25 = vpop.f32.mrf.mxu2 }
 0x23b   : > { %v1473_v37 = vpop.f32.mrf.mxu3  ;;  %v1412_v13 = vadd.f32 %v1395_v25, %v1334_v27  ;;  %v1553_v27 = vpop.f32.mrf.mxu0  ;;  %v1567_v25 = vadd.f32 %v1548_v4, %v3793_v22 }
 0x23c   : > { %v1322_v50 = vpop.f32.mrf.mxu1 }
 0x23d   : > { %v3802_v42 = vadd.f32 %v1473_v37, %v1412_v13  ;;  %v1336_v7 = vadd.f32 %v1322_v50, %v1258_v49  ;;  %v2276_v13 = vld [vmem:[#allocation2 + $0x43] sm:$0xff] }
 0x23e   : > { %v2284_v21 = vpack.c.bf16 %v3779_v23, %v2276_v13  ;;  %v2361_v13 = vld [vmem:[#allocation2 + $0xb4] sm:$0xff] }
 0x23f   : > { %2833 = vmatmul.msk.bf16.gmra.mxu1 %vm258_vm0, %v3544_v17  ;;  %v1568_v22 = vadd.f32 %v1551_v15, %v3802_v42 }
 0x242   : > { %v1397_v60 = vpop.f32.mrf.mxu2 }
 0x243   : > { %v1475_v36 = vpop.f32.mrf.mxu3  ;;  %v1413_v8 = vadd.f32 %v1397_v60, %v1335_v47  ;;  %v1556_v57 = vpop.f32.mrf.mxu0 }
 0x244   : > { %v1324_v30 = vpop.f32.mrf.mxu1 }
 0x245   : > { %v3812_v16 = vadd.f32 %v1475_v36, %v1413_v8  ;;  %v1337_v39 = vadd.f32 %v1324_v30, %v1259_v44  ;;  %v2201_v36 = vld [vmem:[#allocation2 + $0x72] sm:$0xff]  ;;  %v2200_v30 = vld [vmem:[#allocation2 + $0x62] sm:$0xff] }
 0x246   : > { %v2207_v23 = vpack.c.bf16 %v2201_v36, %v2200_v30 }
 0x247   : > { %2849 = vmatmul.msk.bf16.gmra.mxu2 %vm258_vm0, %v1974_v11 }
 0x248   : > { %2865 = vmatmul.msk.bf16.gmra.mxu3 %vm258_vm0, %v3639_v54 }
 0x24a   : > { %v1400_v17 = vpop.f32.mrf.mxu2 }
 0x24b   : > { %v1478_v0 = vpop.f32.mrf.mxu3  ;;  %v1414_v5 = vadd.f32 %v1400_v17, %v1336_v7  ;;  %v1558_v8 = vpop.f32.mrf.mxu0  ;;  %v2279_v17 = vld [vmem:[#allocation2 + $0x73] sm:$0xff] }
 0x24c   : > { %v1327_v29 = vpop.f32.mrf.mxu1 }
 0x24d   : > { %v3823_v38 = vadd.f32 %v1478_v0, %v1414_v5  ;;  %v1338_v19 = vadd.f32 %v1327_v29, %v1260_v10  ;;  %v1569_v5 = vadd.f32 %v1553_v27, %v3812_v16  ;;  %v2278_v29 = vld [vmem:[#allocation2 + $0x63] sm:$0xff] }
 0x24e   : > { %v2285_v15 = vpack.c.bf16 %v2279_v17, %v2278_v29 }
 0x24f   : > { %2834 = vmatmul.msk.bf16.gmra.mxu1 %vm258_vm0, %v1897_v45 }
 0x252   : > { %v1402_v31 = vpop.f32.mrf.mxu2 }
 0x253   : > { %v1480_v54 = vpop.f32.mrf.mxu3  ;;  %v1415_v14 = vadd.f32 %v1402_v31, %v1337_v39  ;;  %v2363_v31 = vpack.c.bf16 %v3810_v62, %v3711_v61  ;;  %v2280_v61 = vld [vmem:[#allocation2 + $0x83] sm:$0xff]  ;;  %v2281_v62 = vld [vmem:[#allocation2 + $0x93] sm:$0xff] }
 0x254   : > { %v1329_v46 = vpop.f32.mrf.mxu1 }
 0x255   : > { %v3832_v20 = vadd.f32 %v1480_v54, %v1415_v14  ;;  %v1339_v40 = vadd.f32 %v1329_v46, %v1261_v48  ;;  %v1570_v48 = vadd.f32 %v1556_v57, %v3823_v38  ;;  %v2286_v38 = vpack.c.bf16 %v2281_v62, %v2280_v61 }
 0x257   : > { %2850 = vmatmul.msk.bf16.gmra.mxu2 %vm258_vm0, %v1975_v26 }
 0x258   : > { %2866 = vmatmul.msk.bf16.gmra.mxu3 %vm258_vm0, %v2053_v12 }
 0x25a   : > { %v1405_v34 = vpop.f32.mrf.mxu2 }
 0x25b   : > { %v1483_v6 = vpop.f32.mrf.mxu3  ;;  %v1416_v63 = vadd.f32 %v1405_v34, %v1338_v19  ;;  %v1561_v19 = vpop.f32.mrf.mxu0 }
 0x25c   : > { %v1624_v32 = vpop.f32.mrf.mxu1 }
 0x25d   : > { %v3840_v52 = vadd.f32 %v1483_v6, %v1416_v63  ;;  %v1644_v24 = vadd.f32 %v1624_v32, %v1566_v33  ;;  %v1571_v6 = vadd.f32 %v1558_v8, %v3832_v20  ;;  %v2364_v32 = vpack.c.bf16 %v3735_v56, %v3806_v43 }
 0x25e   : > { %v2365_v8 = vpack.c.bf16 %v2361_v13, %v3828_v3 }
 0x25f   : > { %2895 = vmatmul.msk.bf16.vlgmr.msra.gmra.mxu1 %vm258_vm0, %v2206_v51  ;;  %v2205_v51 = vld [vmem:[#allocation2 + $0xb2] sm:$0xff] }
 0x262   : > { %v1407_v47 = vpop.f32.mrf.mxu2 }
 0x263   : > { %v1485_v18 = vpop.f32.mrf.mxu3  ;;  %v1417_v53 = vadd.f32 %v1407_v47, %v1339_v40  ;;  %v1563_v26 = vpop.f32.mrf.mxu0  ;;  %v1572_v47 = vadd.f32 %v1561_v19, %v3840_v52 }
 0x264   : > { %v1626_v37 = vpop.f32.mrf.mxu1 }
 0x265   : > { %v3844_v49 = vadd.f32 %v1485_v18, %v1417_v53  ;;  %v1645_v50 = vadd.f32 %v1626_v37, %v1567_v25  ;;  %v2209_v25 = vpack.c.bf16 %v2205_v51, %v3557_v41  ;;  %v2283_v37 = vld [vmem:[#allocation2 + $0xb3] sm:$0xff] }
 0x266   : > { %v2287_v36 = vpack.c.bf16 %v2283_v37, %v3819_v55 }
 0x267   : > { %2911 = vmatmul.msk.bf16.vlgmr.msra.gmra.mxu2 %vm258_vm0, %v2284_v21 }
 0x268   : > { %2927 = vmatmul.msk.bf16.vlgmr.msra.gmra.mxu3 %vm258_vm0, %v2362_v2  ;;  %v1573_v2 = vadd.f32 %v1563_v26, %v3844_v49 }
 0x26a   : > { %v1702_v7 = vpop.f32.mrf.mxu2 }
 0x26b   : > { %v1780_v60 = vpop.f32.mrf.mxu3  ;;  %v1722_v44 = vadd.f32 %v1702_v7, %v1644_v24 }
 0x26c   : > { %v1629_v4 = vpop.f32.mrf.mxu1 }
 0x26d   : > { %v3852_v39 = vadd.f32 %v1780_v60, %v1722_v44  ;;  %v1646_v11 = vadd.f32 %v1629_v4, %v1568_v22 }
 0x26f   : > { %2896 = vmatmul.msk.bf16.gmra.mxu1 %vm258_vm0, %v2207_v23 }
 0x272   : > { %v1704_v59 = vpop.f32.mrf.mxu2 }
 0x273   : > { %v1782_v58 = vpop.f32.mrf.mxu3  ;;  %v1723_v0 = vadd.f32 %v1704_v59, %v1645_v50 }
 0x274   : > { %v1631_v10 = vpop.f32.mrf.mxu1 }
 0x275   : > { %v3856_v45 = vadd.f32 %v1782_v58, %v1723_v0  ;;  %v1647_v42 = vadd.f32 %v1631_v10, %v1569_v5 }
 0x277   : > { %2912 = vmatmul.msk.bf16.gmra.mxu2 %vm258_vm0, %v2285_v15 }
 0x278   : > { %2928 = vmatmul.msk.bf16.gmra.mxu3 %vm258_vm0, %v2363_v31 }
 0x27a   : > { %v1707_v54 = vpop.f32.mrf.mxu2 }
 0x27b   : > { %v1785_v1 = vpop.f32.mrf.mxu3  ;;  %v1724_v14 = vadd.f32 %v1707_v54, %v1646_v11 }
 0x27c   : > { %v1634_v16 = vpop.f32.mrf.mxu1 }
 0x27d   : > { %v3863_v46 = vadd.f32 %v1785_v1, %v1724_v14  ;;  %v1648_v40 = vadd.f32 %v1634_v16, %v1570_v48 }
 0x27f   : > { %2897 = vmatmul.msk.bf16.gmra.mxu1 %vm258_vm0, %v3656_v9  ;;  %v1858_v9 = vpop.f32.mrf.mxu0 }
 0x282   : > { %v1709_v12 = vpop.f32.mrf.mxu2 }
 0x283   : > { %v1787_v27 = vpop.f32.mrf.mxu3  ;;  %v1725_v34 = vadd.f32 %v1709_v12, %v1647_v42 }
 0x284   : > { %v1636_v35 = vpop.f32.mrf.mxu1 }
 0x285   : > { %v3868_v63 = vadd.f32 %v1787_v27, %v1725_v34  ;;  %v1649_v33 = vadd.f32 %v1636_v35, %v1571_v6 }
 0x287   : > { %2913 = vmatmul.msk.bf16.gmra.mxu2 %vm258_vm0, %v2286_v38  ;;  %v1860_v50 = vpop.f32.mrf.mxu0 }
 0x288   : > { %2929 = vmatmul.msk.bf16.gmra.mxu3 %vm258_vm0, %v2364_v32  ;;  %v1878_v32 = vadd.f32 %v1858_v9, %v3852_v39 }
 0x28a   : > { %v1712_v28 = vpop.f32.mrf.mxu2 }
 0x28b   : > { %v1790_v24 = vpop.f32.mrf.mxu3  ;;  %v1726_v57 = vadd.f32 %v1712_v28, %v1648_v40 }
 0x28c   : > { %v1639_v20 = vpop.f32.mrf.mxu1 }
 0x28d   : > { %v3875_v18 = vadd.f32 %v1790_v24, %v1726_v57  ;;  %v1650_v53 = vadd.f32 %v1639_v20, %v1572_v47 }
 0x28f   : > { %2898 = vmatmul.msk.bf16.gmra.mxu1 %vm258_vm0, %v2209_v25  ;;  %v1863_v30 = vpop.f32.mrf.mxu0 }
 0x290   : > { %v1880_v39 = vadd.f32 %v1863_v30, %v3863_v46 }
 0x292   : > { %v1714_v56 = vpop.f32.mrf.mxu2 }
 0x293   : > { %v1792_v43 = vpop.f32.mrf.mxu3  ;;  %v1727_v21 = vadd.f32 %v1714_v56, %v1649_v33 }
 0x294   : > { %v1641_v7 = vpop.f32.mrf.mxu1 }
 0x295   : > { %v3880_v60 = vadd.f32 %v1792_v43, %v1727_v21  ;;  %v1651_v52 = vadd.f32 %v1641_v7, %v1573_v2 }
 0x297   : > { %2914 = vmatmul.msk.bf16.gmra.mxu2 %vm258_vm0, %v2287_v36  ;;  %v1865_v55 = vpop.f32.mrf.mxu0 }
 0x298   : > { %2930 = vmatmul.msk.bf16.gmra.mxu3 %vm258_vm0, %v2365_v8 }
 0x29a   : > { %v1717_v41 = vpop.f32.mrf.mxu2 }
 0x29b   : > { %v1795_v44 = vpop.f32.mrf.mxu3  ;;  %v1728_v22 = vadd.f32 %v1717_v41, %v1650_v53  ;;  %v1879_v53 = vadd.f32 %v1860_v50, %v3856_v45 }
 0x29c   : > { %v1936_v4 = vpop.f32.mrf.mxu1 }
 0x29d   : > { %v3886_v11 = vadd.f32 %v1795_v44, %v1728_v22  ;;  %v1956_v24 = vadd.f32 %v1936_v4, %v1878_v32 }
 0x29f   : > { %v3890_v10 = vpop.f32.mrf.mxu0 }
 0x2a2   : > { %v1719_v49 = vpop.f32.mrf.mxu2 }
 0x2a3   : > { %v1797_v23 = vpop.f32.mrf.mxu3  ;;  %v1729_v59 = vadd.f32 %v1719_v49, %v1651_v52  ;;  %v1881_v49 = vadd.f32 %v1865_v55, %v3868_v63 }
 0x2a4   : > { %v1938_v58 = vpop.f32.mrf.mxu1 }
 0x2a5   : > { %v3888_v17 = vadd.f32 %v1797_v23, %v1729_v59  ;;  %v1957_v43 = vadd.f32 %v1938_v58, %v1879_v53 }
 0x2a7   : > { %v3892_v54 = vpop.f32.mrf.mxu0 }
 0x2aa   : > { %v2014_v0 = vpop.f32.mrf.mxu2 }
 0x2ab   : > { %v2092_v3 = vpop.f32.mrf.mxu3  ;;  %v2034_v51 = vadd.f32 %v2014_v0, %v1956_v24  ;;  %v1882_v24 = vadd.f32 %v3890_v10, %v3875_v18 }
 0x2ac   : > { %v1941_v5 = vpop.f32.mrf.mxu1 }
 0x2ad   : > { %v2112_v25 = vadd.f32 %v2092_v3, %v2034_v51  ;;  %v1958_v41 = vadd.f32 %v1941_v5, %v1880_v39 }
 0x2af   : > { %v3898_v40 = vpop.f32.mrf.mxu0 }
 0x2b2   : > { %v2016_v29 = vpop.f32.mrf.mxu2 }
 0x2b3   : > { %v2094_v19 = vpop.f32.mrf.mxu3  ;;  %v2035_v37 = vadd.f32 %v2016_v29, %v1957_v43 }
 0x2b4   : > { %v1943_v42 = vpop.f32.mrf.mxu1 }
 0x2b5   : > { %v2113_v9 = vadd.f32 %v2094_v19, %v2035_v37  ;;  %v1959_v58 = vadd.f32 %v1943_v42, %v1881_v49 }
 0x2b7   : > { %v3904_v61 = vpop.f32.mrf.mxu0 }
 0x2ba   : > { %v2019_v15 = vpop.f32.mrf.mxu2 }
 0x2bb   : > { %v2097_v31 = vpop.f32.mrf.mxu3  ;;  %v2036_v45 = vadd.f32 %v2019_v15, %v1958_v41 }
 0x2bc   : > { %v3894_v1 = vpop.f32.mrf.mxu1 }
 0x2bd   : > { %v2114_v23 = vadd.f32 %v2097_v31, %v2036_v45  ;;  %v1960_v63 = vadd.f32 %v3894_v1, %v1882_v24 }
 0x2bf   : > { %v2170_v35 = vpop.f32.mrf.mxu0 }
 0x2c0   : > { %v2190_v13 = vadd.f32 %v2170_v35, %v2112_v25 }
 0x2c2   : > { %v2021_v14 = vpop.f32.mrf.mxu2 }
 0x2c3   : > { %v2099_v48 = vpop.f32.mrf.mxu3  ;;  %v2037_v29 = vadd.f32 %v2021_v14, %v1959_v58 }
 0x2c4   : > { %v3896_v16 = vpop.f32.mrf.mxu1 }
 0x2c5   : > { %v2115_v51 = vadd.f32 %v2099_v48, %v2037_v29 }
 0x2c7   : > { %v2172_v20 = vpop.f32.mrf.mxu0 }
 0x2c8   : > { %v2191_v50 = vadd.f32 %v2172_v20, %v2113_v9 }
 0x2ca   : > { %v2024_v26 = vpop.f32.mrf.mxu2 }
 0x2cb   : > { %v3900_v12 = vpop.f32.mrf.mxu3  ;;  %v2038_v42 = vadd.f32 %v2024_v26, %v1960_v63 }
 0x2cc   : > { %v3902_v27 = vpop.f32.mrf.mxu1 }
 0x2cd   : > { %v2116_v18 = vadd.f32 %v3900_v12, %v2038_v42 }
 0x2cf   : > { %v2175_v8 = vpop.f32.mrf.mxu0 }
 0x2d0   : > { %v2192_v19 = vadd.f32 %v2175_v8, %v2114_v23 }
 0x2d2   : > { %v3906_v62 = vpop.f32.mrf.mxu2 }
 0x2d3   : > { %v3908_v34 = vpop.f32.mrf.mxu3 }
 0x2d4   : > { %v3910_v6 = vpop.f32.mrf.mxu1 }
 0x2d7   : > { %v2177_v5 = vpop.f32.mrf.mxu0 }
 0x2d8   : > { %v2193_v31 = vadd.f32 %v2177_v5, %v2115_v51 }
 0x2da   : > { %v3912_v33 = vpop.f32.mrf.mxu2 }
 0x2db   : > { %v3914_v38 = vpop.f32.mrf.mxu3 }
 0x2dc   : > { %v2248_v28 = vpop.f32.mrf.mxu1 }
 0x2dd   : > { %v2268_v21 = vadd.f32 %v2248_v28, %v2190_v13  ;;  %v1883_v13 = vadd.f32 %v3892_v54, %v3880_v60 }
 0x2df   : > { %v2180_v25 = vpop.f32.mrf.mxu0  ;;  %v1961_v48 = vadd.f32 %v3896_v16, %v1883_v13 }
 0x2e1   : > { %v2039_v26 = vadd.f32 %v3906_v62, %v1961_v48 }
 0x2e2   : > { %v3917_v57 = vpop.f32.mrf.mxu2 }
 0x2e3   : > { %v3919_v47 = vpop.f32.mrf.mxu3  ;;  %v2117_v60 = vadd.f32 %v3908_v34, %v2039_v26 }
 0x2e4   : > { %v2250_v56 = vpop.f32.mrf.mxu1 }
 0x2e5   : > { %v2269_v4 = vadd.f32 %v2250_v56, %v2191_v50 }
 0x2e7   : > { %v2182_v12 = vpop.f32.mrf.mxu0 }
 0x2e8   : > { %v2195_v41 = vadd.f32 %v2182_v12, %v2117_v60 }
 0x2ea   : > { %v2326_v2 = vpop.f32.mrf.mxu2 }
 0x2eb   : > { %v2404_v7 = vpop.f32.mrf.mxu3  ;;  %v2346_v52 = vadd.f32 %v2326_v2, %v2268_v21  ;;  %v2194_v21 = vadd.f32 %v2180_v25, %v2116_v18 }
 0x2ec   : > { %v2253_v36 = vpop.f32.mrf.mxu1 }
 0x2ed   : > { %v2424_v44 = vadd.f32 %v2404_v7, %v2346_v52  ;;  %v2270_v15 = vadd.f32 %v2253_v36, %v2192_v19  ;;  %v1884_v36 = vadd.f32 %v3898_v40, %v3886_v11 }
 0x2ef   : > { %v2432_v22 = vmax.f32 %v2424_v44, 0.0  ;;  %v1962_v16 = vadd.f32 %v3902_v27, %v1884_v36  ;;  %v2185_v34 = vpop.f32.mrf.mxu0 }
 0x2f1   : > { %2440 = vst [vmem:[%s3927_s24] sm:$0xff] %v2432_v22  ;;  %v2040_v62 = vadd.f32 %v3912_v33, %v1962_v16 }
 0x2f2   : > { %v2328_v46 = vpop.f32.mrf.mxu2 }
 0x2f3   : > { %v2406_v30 = vpop.f32.mrf.mxu3  ;;  %v2347_v59 = vadd.f32 %v2328_v46, %v2269_v4  ;;  %v1885_v4 = vadd.f32 %v3904_v61, %v3888_v17  ;;  %v2118_v11 = vadd.f32 %v3914_v38, %v2040_v62 }
 0x2f4   : > { %v2255_v3 = vpop.f32.mrf.mxu1 }
 0x2f5   : > { %v2425_v0 = vadd.f32 %v2406_v30, %v2347_v59  ;;  %v2271_v56 = vadd.f32 %v2255_v3, %v2193_v31  ;;  %v1963_v27 = vadd.f32 %v3910_v6, %v1885_v4  ;;  %v2196_v49 = vadd.f32 %v2185_v34, %v2118_v11 }
 0x2f7   : > { %v2433_v35 = vmax.f32 %v2425_v0, 0.0  ;;  %v2041_v33 = vadd.f32 %v3917_v57, %v1963_v27  ;;  %v2187_v3 = vpop.f32.mrf.mxu0 }
 0x2f9   : > { %2441 = vst [vmem:[%s3927_s24 + $0x8] sm:$0xff] %v2433_v35  ;;  %v2119_v17 = vadd.f32 %v3919_v47, %v2041_v33 }
 0x2fa   : > { %v2331_v32 = vpop.f32.mrf.mxu2 }
 0x2fb   : > { %v2409_v28 = vpop.f32.mrf.mxu3  ;;  %v2348_v20 = vadd.f32 %v2331_v32, %v2270_v15  ;;  %v2197_v29 = vadd.f32 %v2187_v3, %v2119_v17 }
 0x2fc   : > { %v2258_v14 = vpop.f32.mrf.mxu1 }
 0x2fd   : > { %v2426_v55 = vadd.f32 %v2409_v28, %v2348_v20  ;;  %v2272_v7 = vadd.f32 %v2258_v14, %v2194_v21 }
 0x2ff   : > { %v2434_v53 = vmax.f32 %v2426_v55, 0.0 }
 0x301   : > { %2442 = vst [vmem:[%s3927_s24 + $0x10] sm:$0xff] %v2434_v53 }
 0x302   : > { %v2333_v43 = vpop.f32.mrf.mxu2 }
 0x303   : > { %v2411_v37 = vpop.f32.mrf.mxu3  ;;  %v2349_v10 = vadd.f32 %v2333_v43, %v2271_v56 }
 0x304   : > { %v2260_v39 = vpop.f32.mrf.mxu1 }
 0x305   : > { %v2427_v1 = vadd.f32 %v2411_v37, %v2349_v10  ;;  %v2273_v45 = vadd.f32 %v2260_v39, %v2195_v41 }
 0x307   : > { %v2435_v2 = vmax.f32 %v2427_v1, 0.0 }
 0x309   : > { %2443 = vst [vmem:[%s3927_s24 + $0x18] sm:$0xff] %v2435_v2 }
 0x30a   : > { %v2336_v9 = vpop.f32.mrf.mxu2 }
 0x30b   : > { %v2414_v52 = vpop.f32.mrf.mxu3  ;;  %v2350_v54 = vadd.f32 %v2336_v9, %v2272_v7 }
 0x30c   : > { %v2263_v46 = vpop.f32.mrf.mxu1 }
 0x30d   : > { %v2428_v8 = vadd.f32 %v2414_v52, %v2350_v54  ;;  %v2274_v59 = vadd.f32 %v2263_v46, %v2196_v49 }
 0x30f   : > { %v2436_v44 = vmax.f32 %v2428_v8, 0.0 }
 0x311   : > { %2444 = vst [vmem:[%s3927_s24 + $0x20] sm:$0xff] %v2436_v44 }
 0x312   : > { %v2338_v50 = vpop.f32.mrf.mxu2 }
 0x313   : > { %v2416_v22 = vpop.f32.mrf.mxu3  ;;  %v2351_v40 = vadd.f32 %v2338_v50, %v2273_v45 }
 0x314   : > { %v2265_v5 = vpop.f32.mrf.mxu1 }
 0x315   : > { %v2429_v30 = vadd.f32 %v2416_v22, %v2351_v40  ;;  %v2275_v6 = vadd.f32 %v2265_v5, %v2197_v29 }
 0x317   : > { %v2437_v23 = vmax.f32 %v2429_v30, 0.0 }
 0x319   : > { %2445 = vst [vmem:[%s3927_s24 + $0x28] sm:$0xff] %v2437_v23 }
 0x31a   : > { %v2341_v58 = vpop.f32.mrf.mxu2 }
 0x31b   : > { %v2419_v0 = vpop.f32.mrf.mxu3  ;;  %v2352_v61 = vadd.f32 %v2341_v58, %v2274_v59 }
 0x31d   : > { %v2430_v38 = vadd.f32 %v2419_v0, %v2352_v61 }
 0x31f   : > { %v2438_v19 = vmax.f32 %v2430_v38, 0.0 }
 0x321   : > { %2446 = vst [vmem:[%s3927_s24 + $0x30] sm:$0xff] %v2438_v19 }
 0x322   : > { %v2343_v35 = vpop.f32.mrf.mxu2 }
 0x323   : > { %v2353_v15 = vadd.f32 %v2343_v35, %v2275_v6  ;;  %v2421_v57 = vpop.f32.mrf.mxu3 }
 0x325   : > { %v2431_v32 = vadd.f32 %v2421_v57, %v2353_v15 }
 0x327   : > { %v2439_v28 = vmax.f32 %v2431_v32, 0.0 }
 0x329   : > { %2447 = vst [vmem:[%s3927_s24 + $0x38] sm:$0xff] %v2439_v28 }
 0x32a PF: > { %s15_s18 = sadd.s32 1, %s3001_s18  }
 0x32b   : > { %p12_p4 = scmp.ge.s32.totalorder %s15_s18, 4  }
 0x32d   :  { %14 = sbr.rel (!%p12_p4) target bundleno = 1 (0x1), region = 105 }

</bundles_post_ra>
